<compile_context>
chip_gen: v7x
topology: tpu7x:2x2x1
jax: 0.10.0
libtpu: 0.0.40
codegen_flags: <defaults>
</compile_context>

<pallas_src>
import functools
import math

import jax
import jax.numpy as jnp
from jax import lax
from jax.experimental import pallas as pl
from jax.experimental.pallas import tpu as pltpu

LN_EPS = 1e-5        # torch nn.LayerNorm default
BASED_EPS = 1e-12    # Based eps (numerically a no-op vs den >= l/2; kept for parity)


def _erf_approx(x):
    # Abramowitz & Stegun 7.1.26 (max abs err ~1.5e-7).
    a1, a2, a3, a4, a5 = 0.254829592, -0.284496736, 1.421413741, -1.453152027, 1.061405429
    p = 0.3275911
    sgn = jnp.where(x >= 0.0, 1.0, -1.0)
    ax = jnp.abs(x)
    t = 1.0 / (1.0 + p * ax)
    poly = ((((a5 * t + a4) * t + a3) * t + a2) * t + a1) * t
    return sgn * (1.0 - poly * jnp.exp(-ax * ax))


def _gelu_exact(x):
    # matches torch nn.GELU() default (erf-based, approximate='none')
    return 0.5 * x * (1.0 + _erf_approx(x * (1.0 / math.sqrt(2.0))))


def _gelu_tanh(x):
    # tanh approximation (EUP tanh) for the bf16 perf config
    c = math.sqrt(2.0 / math.pi)
    return 0.5 * x * (1.0 + jnp.tanh(c * (x + 0.044715 * x * x * x)))


def _block_kernel(x_ref, ln_g_ref, ln_b_ref, convw_ref, convb_ref,
                  projw_ref, projb_ref, wqkv_ref, wo_ref,
                  w1_ref, b1_ref, w2_ref, b2_ref, o_ref,
                  *, l, d, ksz, n_heads, feat_dim, head_dim,
                  approx_recip, approx_gelu):
    f32 = jnp.float32
    cdt = wqkv_ref.dtype                                  # matmul compute dtype (f32 or bf16)

    x = x_ref[...].astype(f32)                            # (l, d)

    # ----------------- LayerNorm (biased variance, eps=1e-5), f32 -----------------
    mu = jnp.mean(x, axis=-1, keepdims=True)
    xc = x - mu
    var = jnp.mean(xc * xc, axis=-1, keepdims=True)
    y = xc * lax.rsqrt(var + LN_EPS) * ln_g_ref[...] + ln_b_ref[...]

    # ----- BaseConv: depthwise causal short conv * linear proj + residual -----
    # Tap j needs y shifted down by s = ksz-1-j rows with zeros on top.  pltpu.roll is a
    # sublane rotation on the XLU (idle slot here); the leading wrapped rows are masked.
    cw = convw_ref[...]                                   # (ksz, d), f32
    row = lax.broadcasted_iota(jnp.int32, (l, d), 0)
    conv = jnp.zeros((l, d), f32)
    for j in range(ksz):                                  # static unrolled taps
        s = ksz - 1 - j
        if s == 0:
            ys = y
        else:
            ys = jnp.where(row >= s, pltpu.roll(y, s, 0), 0.0)
        conv = conv + ys * cw[j:j + 1, :]
    conv = conv + convb_ref[...]

    yc = y.astype(cdt)
    proj = jnp.dot(yc, projw_ref[...], preferred_element_type=f32) + projb_ref[...]
    u = conv * proj + y                                   # (l, d), f32

    # ------- Based linear attention, taylor_exp feature map, non-causal -------
    # Single fused QKV projection, then per head TWO lane-dense MXU matmuls using the
    # explicit (1 + f + f^2)-wide feature map and a ones-augmented V for the denominator.
    uc = u.astype(cdt)
    qkv = jnp.dot(uc, wqkv_ref[...], preferred_element_type=f32)   # (l, H*(2f+hd)) f32
    qoff = 0
    koff = n_heads * feat_dim
    voff = 2 * n_heads * feat_dim

    inv_rrd = feat_dim ** -0.25                 # per-side first-order scale -> q.k/sqrt(f)
    s2 = 1.0 / math.sqrt(2.0 * feat_dim)        # per-side second-order scale -> (q.k)^2/(2f)
    ones_col = jnp.ones((l, 1), f32)            # hoisted (JAX doesn't CSE broadcasts)

    # TODO(synk): for large H, group heads into 128-lane-aligned chunks to avoid sub-vreg
    #             lane slicing of the qkv slab; at demo sizes the cost is negligible.
    head_outs = []
    for h in range(n_heads):
        qh = qkv[:, qoff + h * feat_dim: qoff + (h + 1) * feat_dim]   # (l, f) f32
        kh = qkv[:, koff + h * feat_dim: koff + (h + 1) * feat_dim]   # (l, f)
        vh = qkv[:, voff + h * head_dim: voff + (h + 1) * head_dim]   # (l, hd)

        # second-order features as one lane-dense (l, f*f) block
        q2 = jnp.concatenate([qh[:, i:i + 1] * qh for i in range(feat_dim)], axis=-1)
        k2 = jnp.concatenate([kh[:, i:i + 1] * kh for i in range(feat_dim)], axis=-1)
        phi_q = jnp.concatenate([ones_col, qh * inv_rrd, q2 * s2], axis=-1)  # (l, 1+f+f^2)
        phi_k = jnp.concatenate([ones_col, kh * inv_rrd, k2 * s2], axis=-1)
        v_aug = jnp.concatenate([vh, ones_col], axis=-1)                     # (l, hd+1)

        kv = lax.dot_general(phi_k.astype(cdt), v_aug.astype(cdt),
                             (((0,), (0,)), ((), ())),
                             preferred_element_type=f32)                     # (1+f+f^2, hd+1)
        out = jnp.dot(phi_q.astype(cdt), kv.astype(cdt),
                      preferred_element_type=f32)                            # (l, hd+1)

        num = out[:, :head_dim]
        den = out[:, head_dim:head_dim + 1] + BASED_EPS
        inv = pl.reciprocal(den, approx=True) if approx_recip else 1.0 / den
        head_outs.append(num * inv)

    # concatenate head outputs in registers (no VMEM round trip) and apply Wo once
    attn = jnp.concatenate(head_outs, axis=-1)                               # (l, H*hd)
    yb = jnp.dot(attn.astype(cdt), wo_ref[...], preferred_element_type=f32)  # (l, d)

    # ----------------- FeedForward: Linear -> GELU -> Linear -----------------
    h1 = jnp.dot(yb.astype(cdt), w1_ref[...], preferred_element_type=f32) + b1_ref[...]
    h1 = _gelu_tanh(h1) if approx_gelu else _gelu_exact(h1)
    h2 = jnp.dot(h1.astype(cdt), w2_ref[...], preferred_element_type=f32) + b2_ref[...]

    # ----------------- residual with the block input -----------------
    o_ref[...] = (h2 + x).astype(o_ref.dtype)


_PARAM_ORDER = ("ln_g", "ln_b", "conv_w", "conv_b", "proj_w", "proj_b",
                "wqkv", "wo", "w1", "b1", "w2", "b2")
_MM_WEIGHTS = ("proj_w", "wqkv", "wo", "w1", "w2")


def prepare_params(P, compute_dtype=jnp.float32):
    """Fuse Q/K/V weights and cast matmul weights to the compute dtype ONCE, outside the
    per-step kernel call (avoids a per-call HBM astype pass over every weight)."""
    out = dict(P)
    out["wqkv"] = jnp.concatenate([P["wq"], P["wk"], P["wv"]], axis=1)
    for name in ("wq", "wk", "wv"):
        out.pop(name)
    for name in _MM_WEIGHTS:
        out[name] = out[name].astype(compute_dtype)
    return out


def block_forward(x, params, *, ksz, n_heads, feat_dim, single_buffer_weights=True):
    b, l, d = x.shape
    head_dim = d // n_heads
    cdt = params["wqkv"].dtype
    approx = cdt != jnp.float32

    kernel = functools.partial(_block_kernel, l=l, d=d, ksz=ksz, n_heads=n_heads,
                               feat_dim=feat_dim, head_dim=head_dim,
                               approx_recip=approx, approx_gelu=approx)

    ordered = [params[name] for name in _PARAM_ORDER]

    def weight_spec(arr):
        nd = arr.ndim
        kwargs = {}
        if single_buffer_weights:
            # grid-invariant weights: single-buffer to halve their VMEM footprint
            kwargs["pipeline_mode"] = pl.Buffered(1)
        return pl.BlockSpec(arr.shape, lambda i, _nd=nd: (0,) * _nd, **kwargs)

    batch_spec = pl.BlockSpec((None, l, d), lambda i: (i, 0, 0))   # leading dim squeezed

    return pl.pallas_call(
        kernel,
        out_shape=jax.ShapeDtypeStruct((b, l, d), jnp.float32),
        grid=(b,),
        in_specs=[batch_spec] + [weight_spec(a) for a in ordered],
        out_specs=pl.BlockSpec((None, l, d), lambda i: (i, 0, 0)),
        compiler_params=pltpu.CompilerParams(
            dimension_semantics=("parallel",),           # b >= 2 feeds both v7x TCs
            vmem_limit_bytes=48 * 1024 * 1024),
    )(x, *ordered)


def init_params(key, *, d, hidden, ksz, n_heads, feat_dim):
    head_dim = d // n_heads
    ks = jax.random.split(key, 14)

    def nrm(k, shape, scale):
        return (scale * jax.random.normal(k, shape, jnp.float32)).astype(jnp.float32)

    P = {}
    P["ln_g"] = (1.0 + 0.1 * jax.random.normal(ks[0], (1, d))).astype(jnp.float32)
    P["ln_b"] = nrm(ks[1], (1, d), 0.1)
    P["conv_w"] = nrm(ks[2], (ksz, d), 0.4)            # depthwise Conv1d weight (d,1,k) -> (k,d)
    P["conv_b"] = nrm(ks[3], (1, d), 0.1)
    P["proj_w"] = nrm(ks[4], (d, d), 1.0 / math.sqrt(d))   # stored as x @ W (i.e. torch W.T)
    P["proj_b"] = nrm(ks[5], (1, d), 0.1)
    P["wq"] = nrm(ks[6], (d, n_heads * feat_dim), 1.0 / math.sqrt(d))
    P["wk"] = nrm(ks[7], (d, n_heads * feat_dim), 1.0 / math.sqrt(d))
    P["wv"] = nrm(ks[8], (d, n_heads * head_dim), 1.0 / math.sqrt(d))
    P["wo"] = nrm(ks[9], (n_heads * head_dim, d), 1.0 / math.sqrt(d))
    P["w1"] = nrm(ks[10], (d, hidden), 1.0 / math.sqrt(d))
    P["b1"] = nrm(ks[11], (1, hidden), 0.1)
    P["w2"] = nrm(ks[12], (hidden, d), 1.0 / math.sqrt(hidden))
    P["b2"] = nrm(ks[13], (1, d), 0.1)
    return P


def reference_forward(x, P, *, ksz, n_heads, feat_dim, matmul_dtype=jnp.float32,
                      approx_gelu=False):
    """Pure-JAX mirror of the PyTorch Block.forward (explicit TaylorExp feature map).
    matmul_dtype / approx_gelu mirror the kernel's perf-config choices (f32 accumulation
    either way); in f32 + exact GELU this matches the torch semantics."""
    b, l, d = x.shape
    head_dim = d // n_heads
    x = x.astype(jnp.float32)
    md = matmul_dtype

    def mm(a, w):
        return jnp.dot(a.astype(md), w.astype(md), preferred_element_type=jnp.float32)

    mu = x.mean(-1, keepdims=True)
    var = ((x - mu) ** 2).mean(-1, keepdims=True)
    y = (x - mu) / jnp.sqrt(var + LN_EPS) * P["ln_g"][0] + P["ln_b"][0]

    conv = jnp.zeros_like(y)
    for j in range(ksz):
        s = (ksz - 1) - j
        ys = jnp.pad(y, ((0, 0), (s, 0), (0, 0)))[:, :l, :]
        conv = conv + ys * P["conv_w"][j][None, None, :]
    conv = conv + P["conv_b"][0]
    proj = mm(y, P["proj_w"]) + P["proj_b"][0]
    u = conv * proj + y

    q = mm(u, P["wq"]).reshape(b, l, n_heads, feat_dim).transpose(0, 2, 1, 3)
    k = mm(u, P["wk"]).reshape(b, l, n_heads, feat_dim).transpose(0, 2, 1, 3)
    v = mm(u, P["wv"]).reshape(b, l, n_heads, head_dim).transpose(0, 2, 1, 3)

    r2 = math.sqrt(2.0)
    rd = math.sqrt(feat_dim)
    rrd = math.sqrt(rd)

    def fm(z):
        z2 = (z[..., :, None] * z[..., None, :]).reshape(
            z.shape[:-1] + (feat_dim * feat_dim,)) / r2
        return jnp.concatenate([jnp.ones(z.shape[:-1] + (1,), z.dtype), z / rrd, z2 / rd],
                               axis=-1)

    qf, kf = fm(q), fm(k)
    v_aug = jnp.concatenate([v, jnp.ones(v.shape[:-1] + (1,), v.dtype)], axis=-1)
    kv = jnp.einsum("bhld,bhlv->bhdv", kf.astype(md), v_aug.astype(md),
                    preferred_element_type=jnp.float32)
    out = jnp.einsum("bhld,bhdv->bhlv", qf.astype(md), kv.astype(md),
                     preferred_element_type=jnp.float32)
    num = out[..., :head_dim]
    den = out[..., head_dim:] + BASED_EPS
    attn = (num / den).transpose(0, 2, 1, 3).reshape(b, l, n_heads * head_dim)
    yb = mm(attn, P["wo"])

    h1 = jax.nn.gelu(mm(yb, P["w1"]) + P["b1"][0], approximate=approx_gelu)
    h2 = mm(h1, P["w2"]) + P["b2"][0]
    return h2 + x


if __name__ == "__main__":
    B, L, D = 2, 8, 32
    HIDDEN = 64
    KSZ = 3           # integer kernel_size -> ShortConvolution branch of BaseConv
    N_HEADS = 2       # num_heads == num_key_value_heads
    FEAT_DIM = 4
    assert D % N_HEADS == 0

    key = jax.random.PRNGKey(0)
    kx, kp = jax.random.split(key)
    x = jax.random.normal(kx, (B, L, D), jnp.float32)
    P = init_params(kp, d=D, hidden=HIDDEN, ksz=KSZ, n_heads=N_HEADS, feat_dim=FEAT_DIM)

    prep_f32 = prepare_params(P, jnp.float32)
    prep_bf16 = prepare_params(P, jnp.bfloat16)

    # --- strict f32 parity vs the pure-JAX mirror; also probes whether this JAX build
    #     accepts single-buffered (Buffered(1)) weight BlockSpecs and falls back if not ---
    def run_and_check_f32(single_buffer):
        out = jax.block_until_ready(
            block_forward(x, prep_f32, ksz=KSZ, n_heads=N_HEADS, feat_dim=FEAT_DIM,
                          single_buffer_weights=single_buffer))
        ref = reference_forward(x, P, ksz=KSZ, n_heads=N_HEADS, feat_dim=FEAT_DIM,
                                matmul_dtype=jnp.float32, approx_gelu=False)
        err = float(jnp.max(jnp.abs(out - ref)))
        assert out.shape == (B, L, D), out.shape
        assert err < 2e-3, f"f32 max abs err {err}"

    try:
        run_and_check_f32(True)
        single_buffer = True
    except Exception:
        run_and_check_f32(False)
        single_buffer = False

    # --- bf16-MXU perf config (f32 accumulation, bf16 attention operands, tanh GELU,
    #     approx reciprocal), checked against the matching bf16 mirror ---
    out_bf = jax.block_until_ready(
        block_forward(x, prep_bf16, ksz=KSZ, n_heads=N_HEADS, feat_dim=FEAT_DIM,
                      single_buffer_weights=single_buffer))
    ref_bf = reference_forward(x, P, ksz=KSZ, n_heads=N_HEADS, feat_dim=FEAT_DIM,
                               matmul_dtype=jnp.bfloat16, approx_gelu=True)
    err_bf = float(jnp.max(jnp.abs(out_bf - ref_bf)))
    assert err_bf < 1e-1, f"bf16 max abs err {err_bf}"

    print("KERNEL_OK")
</pallas_src>

<mosaic_0001>
module attributes {stable_mosaic.version = 11 : i64} {
  func.func @_block_kernel(%arg0: i32, %arg1: memref<1x8x32xf32, #tpu.memory_space<vmem>>, %arg2: memref<1x32xf32, #tpu.memory_space<vmem>>, %arg3: memref<1x32xf32, #tpu.memory_space<vmem>>, %arg4: memref<3x32xf32, #tpu.memory_space<vmem>>, %arg5: memref<1x32xf32, #tpu.memory_space<vmem>>, %arg6: memref<32x32xf32, #tpu.memory_space<vmem>>, %arg7: memref<1x32xf32, #tpu.memory_space<vmem>>, %arg8: memref<32x48xf32, #tpu.memory_space<vmem>>, %arg9: memref<32x32xf32, #tpu.memory_space<vmem>>, %arg10: memref<32x64xf32, #tpu.memory_space<vmem>>, %arg11: memref<1x64xf32, #tpu.memory_space<vmem>>, %arg12: memref<64x32xf32, #tpu.memory_space<vmem>>, %arg13: memref<1x32xf32, #tpu.memory_space<vmem>>, %arg14: memref<1x8x32xf32, #tpu.memory_space<vmem>>) attributes {dimension_semantics = [#tpu.dimension_semantics<parallel>], iteration_bounds = array<i64: 2>, scalar_prefetch = 0 : i64, scratch_operands = 0 : i64, tpu.core_type = #tpu.core_type<tc>, window_params = [{transform_indices = @transform_0, window_bounds = array<i64: 1, 8, 32>}, {pipeline_mode = #tpu.pipeline_mode<synchronous>, transform_indices = @transform_1, window_bounds = array<i64: 1, 32>}, {pipeline_mode = #tpu.pipeline_mode<synchronous>, transform_indices = @transform_2, window_bounds = array<i64: 1, 32>}, {pipeline_mode = #tpu.pipeline_mode<synchronous>, transform_indices = @transform_3, window_bounds = array<i64: 3, 32>}, {pipeline_mode = #tpu.pipeline_mode<synchronous>, transform_indices = @transform_4, window_bounds = array<i64: 1, 32>}, {pipeline_mode = #tpu.pipeline_mode<synchronous>, transform_indices = @transform_5, window_bounds = array<i64: 32, 32>}, {pipeline_mode = #tpu.pipeline_mode<synchronous>, transform_indices = @transform_6, window_bounds = array<i64: 1, 32>}, {pipeline_mode = #tpu.pipeline_mode<synchronous>, transform_indices = @transform_7, window_bounds = array<i64: 32, 48>}, {pipeline_mode = #tpu.pipeline_mode<synchronous>, transform_indices = @transform_8, window_bounds = array<i64: 32, 32>}, {pipeline_mode = #tpu.pipeline_mode<synchronous>, transform_indices = @transform_9, window_bounds = array<i64: 32, 64>}, {pipeline_mode = #tpu.pipeline_mode<synchronous>, transform_indices = @transform_10, window_bounds = array<i64: 1, 64>}, {pipeline_mode = #tpu.pipeline_mode<synchronous>, transform_indices = @transform_11, window_bounds = array<i64: 64, 32>}, {pipeline_mode = #tpu.pipeline_mode<synchronous>, transform_indices = @transform_12, window_bounds = array<i64: 1, 32>}, {transform_indices = @transform_13, window_bounds = array<i64: 1, 8, 32>}]} {
    %c0 = arith.constant 0 : index
    %c0_0 = arith.constant 0 : index
    %c0_1 = arith.constant 0 : index
    %0 = vector.load %arg1[%c0, %c0_0, %c0_1] : memref<1x8x32xf32, #tpu.memory_space<vmem>>, vector<1x8x32xf32>
    %1 = vector.shape_cast %0 : vector<1x8x32xf32> to vector<8x32xf32>
    %cst = arith.constant dense<0.000000e+00> : vector<8xf32>
    %2 = vector.multi_reduction <add>, %1, %cst [1] : vector<8x32xf32> to vector<8xf32>
    %3 = vector.shape_cast %2 : vector<8xf32> to vector<8x1xf32>
    %cst_2 = arith.constant 3.200000e+01 : f32
    %4 = vector.broadcast %cst_2 : f32 to vector<8x1xf32>
    %5 = arith.divf %3, %4 : vector<8x1xf32>
    %6 = vector.broadcast %5 : vector<8x1xf32> to vector<8x32xf32>
    %7 = arith.subf %1, %6 : vector<8x32xf32>
    %8 = arith.mulf %7, %7 : vector<8x32xf32>
    %cst_3 = arith.constant dense<0.000000e+00> : vector<8xf32>
    %9 = vector.multi_reduction <add>, %8, %cst_3 [1] : vector<8x32xf32> to vector<8xf32>
    %10 = vector.shape_cast %9 : vector<8xf32> to vector<8x1xf32>
    %cst_4 = arith.constant 3.200000e+01 : f32
    %11 = vector.broadcast %cst_4 : f32 to vector<8x1xf32>
    %12 = arith.divf %10, %11 : vector<8x1xf32>
    %cst_5 = arith.constant 9.99999974E-6 : f32
    %13 = vector.broadcast %cst_5 : f32 to vector<8x1xf32>
    %14 = arith.addf %12, %13 : vector<8x1xf32>
    %15 = math.rsqrt %14 : vector<8x1xf32>
    %16 = vector.broadcast %15 : vector<8x1xf32> to vector<8x32xf32>
    %17 = arith.mulf %7, %16 : vector<8x32xf32>
    %c0_6 = arith.constant 0 : index
    %c0_7 = arith.constant 0 : index
    %18 = vector.load %arg2[%c0_6, %c0_7] : memref<1x32xf32, #tpu.memory_space<vmem>>, vector<1x32xf32>
    %19 = vector.broadcast %18 : vector<1x32xf32> to vector<8x32xf32>
    %20 = arith.mulf %17, %19 : vector<8x32xf32>
    %c0_8 = arith.constant 0 : index
    %c0_9 = arith.constant 0 : index
    %21 = vector.load %arg3[%c0_8, %c0_9] : memref<1x32xf32, #tpu.memory_space<vmem>>, vector<1x32xf32>
    %22 = vector.broadcast %21 : vector<1x32xf32> to vector<8x32xf32>
    %23 = arith.addf %20, %22 : vector<8x32xf32>
    %c0_10 = arith.constant 0 : index
    %c0_11 = arith.constant 0 : index
    %24 = vector.load %arg4[%c0_10, %c0_11] : memref<3x32xf32, #tpu.memory_space<vmem>>, vector<3x32xf32>
    %25 = tpu.iota {dimensions = array<i32: 0>} : vector<8x32xi32>
    %cst_12 = arith.constant 0.000000e+00 : f32
    %26 = vector.broadcast %cst_12 : f32 to vector<8x32xf32>
    %c2_i32 = arith.constant 2 : i32
    %27 = vector.broadcast %c2_i32 : i32 to vector<8x32xi32>
    %28 = arith.cmpi sge, %25, %27 : vector<8x32xi32>
    %c2_i32_13 = arith.constant 2 : i32
    %29 = tpu.dynamic_rotate %23 by %c2_i32_13 dim 0 : vector<8x32xf32>, i32 -> vector<8x32xf32>
    %cst_14 = arith.constant 0.000000e+00 : f32
    %30 = vector.broadcast %cst_14 : f32 to vector<8x32xf32>
    %31 = arith.select %28, %29, %30 : vector<8x32xi1>, vector<8x32xf32>
    %32 = vector.extract_strided_slice %24 {offsets = [0, 0], sizes = [1, 32], strides = [1, 1]} : vector<3x32xf32> to vector<1x32xf32>
    %33 = vector.broadcast %32 : vector<1x32xf32> to vector<8x32xf32>
    %34 = arith.mulf %31, %33 : vector<8x32xf32>
    %35 = arith.addf %26, %34 : vector<8x32xf32>
    %c1_i32 = arith.constant 1 : i32
    %36 = vector.broadcast %c1_i32 : i32 to vector<8x32xi32>
    %37 = arith.cmpi sge, %25, %36 : vector<8x32xi32>
    %c1_i32_15 = arith.constant 1 : i32
    %38 = tpu.dynamic_rotate %23 by %c1_i32_15 dim 0 : vector<8x32xf32>, i32 -> vector<8x32xf32>
    %cst_16 = arith.constant 0.000000e+00 : f32
    %39 = vector.broadcast %cst_16 : f32 to vector<8x32xf32>
    %40 = arith.select %37, %38, %39 : vector<8x32xi1>, vector<8x32xf32>
    %41 = vector.extract_strided_slice %24 {offsets = [1, 0], sizes = [1, 32], strides = [1, 1]} : vector<3x32xf32> to vector<1x32xf32>
    %42 = vector.broadcast %41 : vector<1x32xf32> to vector<8x32xf32>
    %43 = arith.mulf %40, %42 : vector<8x32xf32>
    %44 = arith.addf %35, %43 : vector<8x32xf32>
    %45 = vector.extract_strided_slice %24 {offsets = [2, 0], sizes = [1, 32], strides = [1, 1]} : vector<3x32xf32> to vector<1x32xf32>
    %46 = vector.broadcast %45 : vector<1x32xf32> to vector<8x32xf32>
    %47 = arith.mulf %23, %46 : vector<8x32xf32>
    %48 = arith.addf %44, %47 : vector<8x32xf32>
    %c0_17 = arith.constant 0 : index
    %c0_18 = arith.constant 0 : index
    %49 = vector.load %arg5[%c0_17, %c0_18] : memref<1x32xf32, #tpu.memory_space<vmem>>, vector<1x32xf32>
    %50 = vector.broadcast %49 : vector<1x32xf32> to vector<8x32xf32>
    %51 = arith.addf %48, %50 : vector<8x32xf32>
    %c0_19 = arith.constant 0 : index
    %c0_20 = arith.constant 0 : index
    %52 = vector.load %arg6[%c0_19, %c0_20] : memref<32x32xf32, #tpu.memory_space<vmem>>, vector<32x32xf32>
    %cst_21 = arith.constant dense<0.000000e+00> : vector<8x32xf32>
    %53 = tpu.matmul %23, %52, %cst_21 {dimension_numbers = #tpu.dot_dimension_numbers<[1], [0], [0], [1], [0, 0, 1, 1], [], []>} : vector<8x32xf32>, vector<32x32xf32>, vector<8x32xf32> -> vector<8x32xf32>
    %c0_22 = arith.constant 0 : index
    %c0_23 = arith.constant 0 : index
    %54 = vector.load %arg7[%c0_22, %c0_23] : memref<1x32xf32, #tpu.memory_space<vmem>>, vector<1x32xf32>
    %55 = vector.broadcast %54 : vector<1x32xf32> to vector<8x32xf32>
    %56 = arith.addf %53, %55 : vector<8x32xf32>
    %57 = arith.mulf %51, %56 : vector<8x32xf32>
    %58 = arith.addf %57, %23 : vector<8x32xf32>
    %c0_24 = arith.constant 0 : index
    %c0_25 = arith.constant 0 : index
    %59 = vector.load %arg8[%c0_24, %c0_25] : memref<32x48xf32, #tpu.memory_space<vmem>>, vector<32x48xf32>
    %cst_26 = arith.constant dense<0.000000e+00> : vector<8x48xf32>
    %60 = tpu.matmul %58, %59, %cst_26 {dimension_numbers = #tpu.dot_dimension_numbers<[1], [0], [0], [1], [0, 0, 1, 1], [], []>} : vector<8x32xf32>, vector<32x48xf32>, vector<8x48xf32> -> vector<8x48xf32>
    %cst_27 = arith.constant 1.000000e+00 : f32
    %61 = vector.broadcast %cst_27 : f32 to vector<8x1xf32>
    %62 = vector.extract_strided_slice %60 {offsets = [0, 0], sizes = [8, 4], strides = [1, 1]} : vector<8x48xf32> to vector<8x4xf32>
    %63 = vector.extract_strided_slice %60 {offsets = [0, 8], sizes = [8, 4], strides = [1, 1]} : vector<8x48xf32> to vector<8x4xf32>
    %64 = vector.extract_strided_slice %60 {offsets = [0, 16], sizes = [8, 16], strides = [1, 1]} : vector<8x48xf32> to vector<8x16xf32>
    %65 = vector.extract_strided_slice %62 {offsets = [0, 0], sizes = [8, 1], strides = [1, 1]} : vector<8x4xf32> to vector<8x1xf32>
    %66 = vector.broadcast %65 : vector<8x1xf32> to vector<8x4xf32>
    %67 = arith.mulf %66, %62 : vector<8x4xf32>
    %68 = vector.extract_strided_slice %62 {offsets = [0, 1], sizes = [8, 1], strides = [1, 1]} : vector<8x4xf32> to vector<8x1xf32>
    %69 = vector.broadcast %68 : vector<8x1xf32> to vector<8x4xf32>
    %70 = arith.mulf %69, %62 : vector<8x4xf32>
    %71 = vector.extract_strided_slice %62 {offsets = [0, 2], sizes = [8, 1], strides = [1, 1]} : vector<8x4xf32> to vector<8x1xf32>
    %72 = vector.broadcast %71 : vector<8x1xf32> to vector<8x4xf32>
    %73 = arith.mulf %72, %62 : vector<8x4xf32>
    %74 = vector.extract_strided_slice %62 {offsets = [0, 3], sizes = [8, 1], strides = [1, 1]} : vector<8x4xf32> to vector<8x1xf32>
    %75 = vector.broadcast %74 : vector<8x1xf32> to vector<8x4xf32>
    %76 = arith.mulf %75, %62 : vector<8x4xf32>
    %77 = tpu.concatenate %67, %70, %73, %76 in 1 : vector<8x4xf32>, vector<8x4xf32>, vector<8x4xf32>, vector<8x4xf32> -> vector<8x16xf32>
    %78 = vector.extract_strided_slice %63 {offsets = [0, 0], sizes = [8, 1], strides = [1, 1]} : vector<8x4xf32> to vector<8x1xf32>
    %79 = vector.broadcast %78 : vector<8x1xf32> to vector<8x4xf32>
    %80 = arith.mulf %79, %63 : vector<8x4xf32>
    %81 = vector.extract_strided_slice %63 {offsets = [0, 1], sizes = [8, 1], strides = [1, 1]} : vector<8x4xf32> to vector<8x1xf32>
    %82 = vector.broadcast %81 : vector<8x1xf32> to vector<8x4xf32>
    %83 = arith.mulf %82, %63 : vector<8x4xf32>
    %84 = vector.extract_strided_slice %63 {offsets = [0, 2], sizes = [8, 1], strides = [1, 1]} : vector<8x4xf32> to vector<8x1xf32>
    %85 = vector.broadcast %84 : vector<8x1xf32> to vector<8x4xf32>
    %86 = arith.mulf %85, %63 : vector<8x4xf32>
    %87 = vector.extract_strided_slice %63 {offsets = [0, 3], sizes = [8, 1], strides = [1, 1]} : vector<8x4xf32> to vector<8x1xf32>
    %88 = vector.broadcast %87 : vector<8x1xf32> to vector<8x4xf32>
    %89 = arith.mulf %88, %63 : vector<8x4xf32>
    %90 = tpu.concatenate %80, %83, %86, %89 in 1 : vector<8x4xf32>, vector<8x4xf32>, vector<8x4xf32>, vector<8x4xf32> -> vector<8x16xf32>
    %cst_28 = arith.constant 0.707106769 : f32
    %91 = vector.broadcast %cst_28 : f32 to vector<8x4xf32>
    %92 = arith.mulf %62, %91 : vector<8x4xf32>
    %cst_29 = arith.constant 0.353553385 : f32
    %93 = vector.broadcast %cst_29 : f32 to vector<8x16xf32>
    %94 = arith.mulf %77, %93 : vector<8x16xf32>
    %95 = tpu.concatenate %61, %92, %94 in 1 : vector<8x1xf32>, vector<8x4xf32>, vector<8x16xf32> -> vector<8x21xf32>
    %cst_30 = arith.constant 0.707106769 : f32
    %96 = vector.broadcast %cst_30 : f32 to vector<8x4xf32>
    %97 = arith.mulf %63, %96 : vector<8x4xf32>
    %cst_31 = arith.constant 0.353553385 : f32
    %98 = vector.broadcast %cst_31 : f32 to vector<8x16xf32>
    %99 = arith.mulf %90, %98 : vector<8x16xf32>
    %100 = tpu.concatenate %61, %97, %99 in 1 : vector<8x1xf32>, vector<8x4xf32>, vector<8x16xf32> -> vector<8x21xf32>
    %101 = tpu.concatenate %64, %61 in 1 : vector<8x16xf32>, vector<8x1xf32> -> vector<8x17xf32>
    %cst_32 = arith.constant dense<0.000000e+00> : vector<21x17xf32>
    %102 = tpu.matmul %100, %101, %cst_32 {dimension_numbers = #tpu.dot_dimension_numbers<[0], [0], [1], [1], [0, 1, 1, 1], [], []>} : vector<8x21xf32>, vector<8x17xf32>, vector<21x17xf32> -> vector<21x17xf32>
    %cst_33 = arith.constant dense<0.000000e+00> : vector<8x17xf32>
    %103 = tpu.matmul %95, %102, %cst_33 {dimension_numbers = #tpu.dot_dimension_numbers<[1], [0], [0], [1], [0, 0, 1, 1], [], []>} : vector<8x21xf32>, vector<21x17xf32>, vector<8x17xf32> -> vector<8x17xf32>
    %104 = vector.extract_strided_slice %103 {offsets = [0, 0], sizes = [8, 16], strides = [1, 1]} : vector<8x17xf32> to vector<8x16xf32>
    %105 = vector.extract_strided_slice %103 {offsets = [0, 16], sizes = [8, 1], strides = [1, 1]} : vector<8x17xf32> to vector<8x1xf32>
    %cst_34 = arith.constant 9.99999996E-13 : f32
    %106 = vector.broadcast %cst_34 : f32 to vector<8x1xf32>
    %107 = arith.addf %105, %106 : vector<8x1xf32>
    %cst_35 = arith.constant 1.000000e+00 : f32
    %108 = vector.broadcast %cst_35 : f32 to vector<8x1xf32>
    %109 = arith.divf %108, %107 : vector<8x1xf32>
    %110 = vector.broadcast %109 : vector<8x1xf32> to vector<8x16xf32>
    %111 = arith.mulf %104, %110 : vector<8x16xf32>
    %112 = vector.extract_strided_slice %60 {offsets = [0, 4], sizes = [8, 4], strides = [1, 1]} : vector<8x48xf32> to vector<8x4xf32>
    %113 = vector.extract_strided_slice %60 {offsets = [0, 12], sizes = [8, 4], strides = [1, 1]} : vector<8x48xf32> to vector<8x4xf32>
    %114 = vector.extract_strided_slice %60 {offsets = [0, 32], sizes = [8, 16], strides = [1, 1]} : vector<8x48xf32> to vector<8x16xf32>
    %115 = vector.extract_strided_slice %112 {offsets = [0, 0], sizes = [8, 1], strides = [1, 1]} : vector<8x4xf32> to vector<8x1xf32>
    %116 = vector.broadcast %115 : vector<8x1xf32> to vector<8x4xf32>
    %117 = arith.mulf %116, %112 : vector<8x4xf32>
    %118 = vector.extract_strided_slice %112 {offsets = [0, 1], sizes = [8, 1], strides = [1, 1]} : vector<8x4xf32> to vector<8x1xf32>
    %119 = vector.broadcast %118 : vector<8x1xf32> to vector<8x4xf32>
    %120 = arith.mulf %119, %112 : vector<8x4xf32>
    %121 = vector.extract_strided_slice %112 {offsets = [0, 2], sizes = [8, 1], strides = [1, 1]} : vector<8x4xf32> to vector<8x1xf32>
    %122 = vector.broadcast %121 : vector<8x1xf32> to vector<8x4xf32>
    %123 = arith.mulf %122, %112 : vector<8x4xf32>
    %124 = vector.extract_strided_slice %112 {offsets = [0, 3], sizes = [8, 1], strides = [1, 1]} : vector<8x4xf32> to vector<8x1xf32>
    %125 = vector.broadcast %124 : vector<8x1xf32> to vector<8x4xf32>
    %126 = arith.mulf %125, %112 : vector<8x4xf32>
    %127 = tpu.concatenate %117, %120, %123, %126 in 1 : vector<8x4xf32>, vector<8x4xf32>, vector<8x4xf32>, vector<8x4xf32> -> vector<8x16xf32>
    %128 = vector.extract_strided_slice %113 {offsets = [0, 0], sizes = [8, 1], strides = [1, 1]} : vector<8x4xf32> to vector<8x1xf32>
    %129 = vector.broadcast %128 : vector<8x1xf32> to vector<8x4xf32>
    %130 = arith.mulf %129, %113 : vector<8x4xf32>
    %131 = vector.extract_strided_slice %113 {offsets = [0, 1], sizes = [8, 1], strides = [1, 1]} : vector<8x4xf32> to vector<8x1xf32>
    %132 = vector.broadcast %131 : vector<8x1xf32> to vector<8x4xf32>
    %133 = arith.mulf %132, %113 : vector<8x4xf32>
    %134 = vector.extract_strided_slice %113 {offsets = [0, 2], sizes = [8, 1], strides = [1, 1]} : vector<8x4xf32> to vector<8x1xf32>
    %135 = vector.broadcast %134 : vector<8x1xf32> to vector<8x4xf32>
    %136 = arith.mulf %135, %113 : vector<8x4xf32>
    %137 = vector.extract_strided_slice %113 {offsets = [0, 3], sizes = [8, 1], strides = [1, 1]} : vector<8x4xf32> to vector<8x1xf32>
    %138 = vector.broadcast %137 : vector<8x1xf32> to vector<8x4xf32>
    %139 = arith.mulf %138, %113 : vector<8x4xf32>
    %140 = tpu.concatenate %130, %133, %136, %139 in 1 : vector<8x4xf32>, vector<8x4xf32>, vector<8x4xf32>, vector<8x4xf32> -> vector<8x16xf32>
    %cst_36 = arith.constant 0.707106769 : f32
    %141 = vector.broadcast %cst_36 : f32 to vector<8x4xf32>
    %142 = arith.mulf %112, %141 : vector<8x4xf32>
    %cst_37 = arith.constant 0.353553385 : f32
    %143 = vector.broadcast %cst_37 : f32 to vector<8x16xf32>
    %144 = arith.mulf %127, %143 : vector<8x16xf32>
    %145 = tpu.concatenate %61, %142, %144 in 1 : vector<8x1xf32>, vector<8x4xf32>, vector<8x16xf32> -> vector<8x21xf32>
    %cst_38 = arith.constant 0.707106769 : f32
    %146 = vector.broadcast %cst_38 : f32 to vector<8x4xf32>
    %147 = arith.mulf %113, %146 : vector<8x4xf32>
    %cst_39 = arith.constant 0.353553385 : f32
    %148 = vector.broadcast %cst_39 : f32 to vector<8x16xf32>
    %149 = arith.mulf %140, %148 : vector<8x16xf32>
    %150 = tpu.concatenate %61, %147, %149 in 1 : vector<8x1xf32>, vector<8x4xf32>, vector<8x16xf32> -> vector<8x21xf32>
    %151 = tpu.concatenate %114, %61 in 1 : vector<8x16xf32>, vector<8x1xf32> -> vector<8x17xf32>
    %cst_40 = arith.constant dense<0.000000e+00> : vector<21x17xf32>
    %152 = tpu.matmul %150, %151, %cst_40 {dimension_numbers = #tpu.dot_dimension_numbers<[0], [0], [1], [1], [0, 1, 1, 1], [], []>} : vector<8x21xf32>, vector<8x17xf32>, vector<21x17xf32> -> vector<21x17xf32>
    %cst_41 = arith.constant dense<0.000000e+00> : vector<8x17xf32>
    %153 = tpu.matmul %145, %152, %cst_41 {dimension_numbers = #tpu.dot_dimension_numbers<[1], [0], [0], [1], [0, 0, 1, 1], [], []>} : vector<8x21xf32>, vector<21x17xf32>, vector<8x17xf32> -> vector<8x17xf32>
    %154 = vector.extract_strided_slice %153 {offsets = [0, 0], sizes = [8, 16], strides = [1, 1]} : vector<8x17xf32> to vector<8x16xf32>
    %155 = vector.extract_strided_slice %153 {offsets = [0, 16], sizes = [8, 1], strides = [1, 1]} : vector<8x17xf32> to vector<8x1xf32>
    %cst_42 = arith.constant 9.99999996E-13 : f32
    %156 = vector.broadcast %cst_42 : f32 to vector<8x1xf32>
    %157 = arith.addf %155, %156 : vector<8x1xf32>
    %cst_43 = arith.constant 1.000000e+00 : f32
    %158 = vector.broadcast %cst_43 : f32 to vector<8x1xf32>
    %159 = arith.divf %158, %157 : vector<8x1xf32>
    %160 = vector.broadcast %159 : vector<8x1xf32> to vector<8x16xf32>
    %161 = arith.mulf %154, %160 : vector<8x16xf32>
    %162 = tpu.concatenate %111, %161 in 1 : vector<8x16xf32>, vector<8x16xf32> -> vector<8x32xf32>
    %c0_44 = arith.constant 0 : index
    %c0_45 = arith.constant 0 : index
    %163 = vector.load %arg9[%c0_44, %c0_45] : memref<32x32xf32, #tpu.memory_space<vmem>>, vector<32x32xf32>
    %cst_46 = arith.constant dense<0.000000e+00> : vector<8x32xf32>
    %164 = tpu.matmul %162, %163, %cst_46 {dimension_numbers = #tpu.dot_dimension_numbers<[1], [0], [0], [1], [0, 0, 1, 1], [], []>} : vector<8x32xf32>, vector<32x32xf32>, vector<8x32xf32> -> vector<8x32xf32>
    %c0_47 = arith.constant 0 : index
    %c0_48 = arith.constant 0 : index
    %165 = vector.load %arg10[%c0_47, %c0_48] : memref<32x64xf32, #tpu.memory_space<vmem>>, vector<32x64xf32>
    %cst_49 = arith.constant dense<0.000000e+00> : vector<8x64xf32>
    %166 = tpu.matmul %164, %165, %cst_49 {dimension_numbers = #tpu.dot_dimension_numbers<[1], [0], [0], [1], [0, 0, 1, 1], [], []>} : vector<8x32xf32>, vector<32x64xf32>, vector<8x64xf32> -> vector<8x64xf32>
    %c0_50 = arith.constant 0 : index
    %c0_51 = arith.constant 0 : index
    %167 = vector.load %arg11[%c0_50, %c0_51] : memref<1x64xf32, #tpu.memory_space<vmem>>, vector<1x64xf32>
    %168 = vector.broadcast %167 : vector<1x64xf32> to vector<8x64xf32>
    %169 = arith.addf %166, %168 : vector<8x64xf32>
    %cst_52 = arith.constant 5.000000e-01 : f32
    %170 = vector.broadcast %cst_52 : f32 to vector<8x64xf32>
    %171 = arith.mulf %170, %169 : vector<8x64xf32>
    %cst_53 = arith.constant 0.707106769 : f32
    %172 = vector.broadcast %cst_53 : f32 to vector<8x64xf32>
    %173 = arith.mulf %169, %172 : vector<8x64xf32>
    %cst_54 = arith.constant 0.000000e+00 : f32
    %174 = vector.broadcast %cst_54 : f32 to vector<8x64xf32>
    %175 = arith.cmpf oge, %173, %174 : vector<8x64xf32>
    %cst_55 = arith.constant 1.000000e+00 : f32
    %cst_56 = arith.constant -1.000000e+00 : f32
    %176 = vector.broadcast %cst_55 : f32 to vector<8x64xf32>
    %177 = vector.broadcast %cst_56 : f32 to vector<8x64xf32>
    %178 = arith.select %175, %176, %177 : vector<8x64xi1>, vector<8x64xf32>
    %179 = math.absf %173 : vector<8x64xf32>
    %cst_57 = arith.constant 0.327591091 : f32
    %180 = vector.broadcast %cst_57 : f32 to vector<8x64xf32>
    %181 = arith.mulf %180, %179 : vector<8x64xf32>
    %cst_58 = arith.constant 1.000000e+00 : f32
    %182 = vector.broadcast %cst_58 : f32 to vector<8x64xf32>
    %183 = arith.addf %182, %181 : vector<8x64xf32>
    %cst_59 = arith.constant 1.000000e+00 : f32
    %184 = vector.broadcast %cst_59 : f32 to vector<8x64xf32>
    %185 = arith.divf %184, %183 : vector<8x64xf32>
    %cst_60 = arith.constant 1.06140542 : f32
    %186 = vector.broadcast %cst_60 : f32 to vector<8x64xf32>
    %187 = arith.mulf %186, %185 : vector<8x64xf32>
    %cst_61 = arith.constant -1.45315206 : f32
    %188 = vector.broadcast %cst_61 : f32 to vector<8x64xf32>
    %189 = arith.addf %187, %188 : vector<8x64xf32>
    %190 = arith.mulf %189, %185 : vector<8x64xf32>
    %cst_62 = arith.constant 1.42141378 : f32
    %191 = vector.broadcast %cst_62 : f32 to vector<8x64xf32>
    %192 = arith.addf %190, %191 : vector<8x64xf32>
    %193 = arith.mulf %192, %185 : vector<8x64xf32>
    %cst_63 = arith.constant -0.284496725 : f32
    %194 = vector.broadcast %cst_63 : f32 to vector<8x64xf32>
    %195 = arith.addf %193, %194 : vector<8x64xf32>
    %196 = arith.mulf %195, %185 : vector<8x64xf32>
    %cst_64 = arith.constant 0.254829586 : f32
    %197 = vector.broadcast %cst_64 : f32 to vector<8x64xf32>
    %198 = arith.addf %196, %197 : vector<8x64xf32>
    %199 = arith.mulf %198, %185 : vector<8x64xf32>
    %cst_65 = arith.constant 0.000000e+00 : f32
    %200 = vector.broadcast %cst_65 : f32 to vector<8x64xf32>
    %201 = arith.subf %200, %179 : vector<8x64xf32>
    %202 = arith.mulf %201, %179 : vector<8x64xf32>
    %203 = math.exp %202 : vector<8x64xf32>
    %204 = arith.mulf %199, %203 : vector<8x64xf32>
    %cst_66 = arith.constant 1.000000e+00 : f32
    %205 = vector.broadcast %cst_66 : f32 to vector<8x64xf32>
    %206 = arith.subf %205, %204 : vector<8x64xf32>
    %207 = arith.mulf %178, %206 : vector<8x64xf32>
    %cst_67 = arith.constant 1.000000e+00 : f32
    %208 = vector.broadcast %cst_67 : f32 to vector<8x64xf32>
    %209 = arith.addf %208, %207 : vector<8x64xf32>
    %210 = arith.mulf %171, %209 : vector<8x64xf32>
    %c0_68 = arith.constant 0 : index
    %c0_69 = arith.constant 0 : index
    %211 = vector.load %arg12[%c0_68, %c0_69] : memref<64x32xf32, #tpu.memory_space<vmem>>, vector<64x32xf32>
    %cst_70 = arith.constant dense<0.000000e+00> : vector<8x32xf32>
    %212 = tpu.matmul %210, %211, %cst_70 {dimension_numbers = #tpu.dot_dimension_numbers<[1], [0], [0], [1], [0, 0, 1, 1], [], []>} : vector<8x64xf32>, vector<64x32xf32>, vector<8x32xf32> -> vector<8x32xf32>
    %c0_71 = arith.constant 0 : index
    %c0_72 = arith.constant 0 : index
    %213 = vector.load %arg13[%c0_71, %c0_72] : memref<1x32xf32, #tpu.memory_space<vmem>>, vector<1x32xf32>
    %214 = vector.broadcast %213 : vector<1x32xf32> to vector<8x32xf32>
    %215 = arith.addf %212, %214 : vector<8x32xf32>
    %216 = arith.addf %215, %1 : vector<8x32xf32>
    %c0_73 = arith.constant 0 : index
    %c0_74 = arith.constant 0 : index
    %c0_75 = arith.constant 0 : index
    %217 = vector.load %arg14[%c0_73, %c0_74, %c0_75] : memref<1x8x32xf32, #tpu.memory_space<vmem>>, vector<1x8x32xf32>
    %218 = vector.shape_cast %217 : vector<1x8x32xf32> to vector<8x32xf32>
    %219 = vector.shape_cast %216 : vector<8x32xf32> to vector<1x8x32xf32>
    tpu.vector_store %arg14[%c0_73, %c0_74, %c0_75], %219 {strides = array<i32>} : memref<1x8x32xf32, #tpu.memory_space<vmem>>, vector<1x8x32xf32>,
    return
  }
  func.func @transform_0(%arg0: i32) -> (i32, i32, i32) {
    %c0_i32 = arith.constant 0 : i32
    %c0_i32_0 = arith.constant 0 : i32
    %c0_i32_1 = arith.constant 0 : i32
    return %arg0, %c0_i32, %c0_i32_0 : i32, i32, i32
  }
  func.func @transform_1(%arg0: i32) -> (i32, i32) {
    %c0_i32 = arith.constant 0 : i32
    %c0_i32_0 = arith.constant 0 : i32
    %c0_i32_1 = arith.constant 0 : i32
    return %c0_i32, %c0_i32_0 : i32, i32
  }
  func.func @transform_2(%arg0: i32) -> (i32, i32) {
    %c0_i32 = arith.constant 0 : i32
    %c0_i32_0 = arith.constant 0 : i32
    %c0_i32_1 = arith.constant 0 : i32
    return %c0_i32, %c0_i32_0 : i32, i32
  }
  func.func @transform_3(%arg0: i32) -> (i32, i32) {
    %c0_i32 = arith.constant 0 : i32
    %c0_i32_0 = arith.constant 0 : i32
    %c0_i32_1 = arith.constant 0 : i32
    return %c0_i32, %c0_i32_0 : i32, i32
  }
  func.func @transform_4(%arg0: i32) -> (i32, i32) {
    %c0_i32 = arith.constant 0 : i32
    %c0_i32_0 = arith.constant 0 : i32
    %c0_i32_1 = arith.constant 0 : i32
    return %c0_i32, %c0_i32_0 : i32, i32
  }
  func.func @transform_5(%arg0: i32) -> (i32, i32) {
    %c0_i32 = arith.constant 0 : i32
    %c0_i32_0 = arith.constant 0 : i32
    %c0_i32_1 = arith.constant 0 : i32
    return %c0_i32, %c0_i32_0 : i32, i32
  }
  func.func @transform_6(%arg0: i32) -> (i32, i32) {
    %c0_i32 = arith.constant 0 : i32
    %c0_i32_0 = arith.constant 0 : i32
    %c0_i32_1 = arith.constant 0 : i32
    return %c0_i32, %c0_i32_0 : i32, i32
  }
  func.func @transform_7(%arg0: i32) -> (i32, i32) {
    %c0_i32 = arith.constant 0 : i32
    %c0_i32_0 = arith.constant 0 : i32
    %c0_i32_1 = arith.constant 0 : i32
    return %c0_i32, %c0_i32_0 : i32, i32
  }
  func.func @transform_8(%arg0: i32) -> (i32, i32) {
    %c0_i32 = arith.constant 0 : i32
    %c0_i32_0 = arith.constant 0 : i32
    %c0_i32_1 = arith.constant 0 : i32
    return %c0_i32, %c0_i32_0 : i32, i32
  }
  func.func @transform_9(%arg0: i32) -> (i32, i32) {
    %c0_i32 = arith.constant 0 : i32
    %c0_i32_0 = arith.constant 0 : i32
    %c0_i32_1 = arith.constant 0 : i32
    return %c0_i32, %c0_i32_0 : i32, i32
  }
  func.func @transform_10(%arg0: i32) -> (i32, i32) {
    %c0_i32 = arith.constant 0 : i32
    %c0_i32_0 = arith.constant 0 : i32
    %c0_i32_1 = arith.constant 0 : i32
    return %c0_i32, %c0_i32_0 : i32, i32
  }
  func.func @transform_11(%arg0: i32) -> (i32, i32) {
    %c0_i32 = arith.constant 0 : i32
    %c0_i32_0 = arith.constant 0 : i32
    %c0_i32_1 = arith.constant 0 : i32
    return %c0_i32, %c0_i32_0 : i32, i32
  }
  func.func @transform_12(%arg0: i32) -> (i32, i32) {
    %c0_i32 = arith.constant 0 : i32
    %c0_i32_0 = arith.constant 0 : i32
    %c0_i32_1 = arith.constant 0 : i32
    return %c0_i32, %c0_i32_0 : i32, i32
  }
  func.func @transform_13(%arg0: i32) -> (i32, i32, i32) {
    %c0_i32 = arith.constant 0 : i32
    %c0_i32_0 = arith.constant 0 : i32
    %c0_i32_1 = arith.constant 0 : i32
    return %arg0, %c0_i32, %c0_i32_0 : i32, i32, i32
  }
}

module attributes {stable_mosaic.version = 11 : i64} {
  func.func @_block_kernel(%arg0: i32, %arg1: memref<1x8x32xf32, #tpu.memory_space<vmem>>, %arg2: memref<1x32xf32, #tpu.memory_space<vmem>>, %arg3: memref<1x32xf32, #tpu.memory_space<vmem>>, %arg4: memref<3x32xf32, #tpu.memory_space<vmem>>, %arg5: memref<1x32xf32, #tpu.memory_space<vmem>>, %arg6: memref<32x32xf32, #tpu.memory_space<vmem>>, %arg7: memref<1x32xf32, #tpu.memory_space<vmem>>, %arg8: memref<32x48xf32, #tpu.memory_space<vmem>>, %arg9: memref<32x32xf32, #tpu.memory_space<vmem>>, %arg10: memref<32x64xf32, #tpu.memory_space<vmem>>, %arg11: memref<1x64xf32, #tpu.memory_space<vmem>>, %arg12: memref<64x32xf32, #tpu.memory_space<vmem>>, %arg13: memref<1x32xf32, #tpu.memory_space<vmem>>, %arg14: memref<1x8x32xf32, #tpu.memory_space<vmem>>) attributes {dimension_semantics = [#tpu.dimension_semantics<parallel>], iteration_bounds = array<i64: 2>, scalar_prefetch = 0 : i64, scratch_operands = 0 : i64, tpu.core_type = #tpu.core_type<tc>, window_params = [{transform_indices = @transform_0, window_bounds = array<i64: 1, 8, 32>}, {pipeline_mode = #tpu.pipeline_mode<synchronous>, transform_indices = @transform_1, window_bounds = array<i64: 1, 32>}, {pipeline_mode = #tpu.pipeline_mode<synchronous>, transform_indices = @transform_2, window_bounds = array<i64: 1, 32>}, {pipeline_mode = #tpu.pipeline_mode<synchronous>, transform_indices = @transform_3, window_bounds = array<i64: 3, 32>}, {pipeline_mode = #tpu.pipeline_mode<synchronous>, transform_indices = @transform_4, window_bounds = array<i64: 1, 32>}, {pipeline_mode = #tpu.pipeline_mode<synchronous>, transform_indices = @transform_5, window_bounds = array<i64: 32, 32>}, {pipeline_mode = #tpu.pipeline_mode<synchronous>, transform_indices = @transform_6, window_bounds = array<i64: 1, 32>}, {pipeline_mode = #tpu.pipeline_mode<synchronous>, transform_indices = @transform_7, window_bounds = array<i64: 32, 48>}, {pipeline_mode = #tpu.pipeline_mode<synchronous>, transform_indices = @transform_8, window_bounds = array<i64: 32, 32>}, {pipeline_mode = #tpu.pipeline_mode<synchronous>, transform_indices = @transform_9, window_bounds = array<i64: 32, 64>}, {pipeline_mode = #tpu.pipeline_mode<synchronous>, transform_indices = @transform_10, window_bounds = array<i64: 1, 64>}, {pipeline_mode = #tpu.pipeline_mode<synchronous>, transform_indices = @transform_11, window_bounds = array<i64: 64, 32>}, {pipeline_mode = #tpu.pipeline_mode<synchronous>, transform_indices = @transform_12, window_bounds = array<i64: 1, 32>}, {transform_indices = @transform_13, window_bounds = array<i64: 1, 8, 32>}]} {
    %c0 = arith.constant 0 : index
    %c0_0 = arith.constant 0 : index
    %c0_1 = arith.constant 0 : index
    %0 = vector.load %arg1[%c0, %c0_0, %c0_1] : memref<1x8x32xf32, #tpu.memory_space<vmem>>, vector<1x8x32xf32>
    %1 = vector.shape_cast %0 : vector<1x8x32xf32> to vector<8x32xf32>
    %cst = arith.constant dense<0.000000e+00> : vector<8xf32>
    %2 = vector.multi_reduction <add>, %1, %cst [1] : vector<8x32xf32> to vector<8xf32>
    %3 = vector.shape_cast %2 : vector<8xf32> to vector<8x1xf32>
    %cst_2 = arith.constant 3.200000e+01 : f32
    %4 = vector.broadcast %cst_2 : f32 to vector<8x1xf32>
    %5 = arith.divf %3, %4 : vector<8x1xf32>
    %6 = vector.broadcast %5 : vector<8x1xf32> to vector<8x32xf32>
    %7 = arith.subf %1, %6 : vector<8x32xf32>
    %8 = arith.mulf %7, %7 : vector<8x32xf32>
    %cst_3 = arith.constant dense<0.000000e+00> : vector<8xf32>
    %9 = vector.multi_reduction <add>, %8, %cst_3 [1] : vector<8x32xf32> to vector<8xf32>
    %10 = vector.shape_cast %9 : vector<8xf32> to vector<8x1xf32>
    %cst_4 = arith.constant 3.200000e+01 : f32
    %11 = vector.broadcast %cst_4 : f32 to vector<8x1xf32>
    %12 = arith.divf %10, %11 : vector<8x1xf32>
    %cst_5 = arith.constant 9.99999974E-6 : f32
    %13 = vector.broadcast %cst_5 : f32 to vector<8x1xf32>
    %14 = arith.addf %12, %13 : vector<8x1xf32>
    %15 = math.rsqrt %14 : vector<8x1xf32>
    %16 = vector.broadcast %15 : vector<8x1xf32> to vector<8x32xf32>
    %17 = arith.mulf %7, %16 : vector<8x32xf32>
    %c0_6 = arith.constant 0 : index
    %c0_7 = arith.constant 0 : index
    %18 = vector.load %arg2[%c0_6, %c0_7] : memref<1x32xf32, #tpu.memory_space<vmem>>, vector<1x32xf32>
    %19 = vector.broadcast %18 : vector<1x32xf32> to vector<8x32xf32>
    %20 = arith.mulf %17, %19 : vector<8x32xf32>
    %c0_8 = arith.constant 0 : index
    %c0_9 = arith.constant 0 : index
    %21 = vector.load %arg3[%c0_8, %c0_9] : memref<1x32xf32, #tpu.memory_space<vmem>>, vector<1x32xf32>
    %22 = vector.broadcast %21 : vector<1x32xf32> to vector<8x32xf32>
    %23 = arith.addf %20, %22 : vector<8x32xf32>
    %c0_10 = arith.constant 0 : index
    %c0_11 = arith.constant 0 : index
    %24 = vector.load %arg4[%c0_10, %c0_11] : memref<3x32xf32, #tpu.memory_space<vmem>>, vector<3x32xf32>
    %25 = tpu.iota {dimensions = array<i32: 0>} : vector<8x32xi32>
    %cst_12 = arith.constant 0.000000e+00 : f32
    %26 = vector.broadcast %cst_12 : f32 to vector<8x32xf32>
    %c2_i32 = arith.constant 2 : i32
    %27 = vector.broadcast %c2_i32 : i32 to vector<8x32xi32>
    %28 = arith.cmpi sge, %25, %27 : vector<8x32xi32>
    %c2_i32_13 = arith.constant 2 : i32
    %29 = tpu.dynamic_rotate %23 by %c2_i32_13 dim 0 : vector<8x32xf32>, i32 -> vector<8x32xf32>
    %cst_14 = arith.constant 0.000000e+00 : f32
    %30 = vector.broadcast %cst_14 : f32 to vector<8x32xf32>
    %31 = arith.select %28, %29, %30 : vector<8x32xi1>, vector<8x32xf32>
    %32 = vector.extract_strided_slice %24 {offsets = [0, 0], sizes = [1, 32], strides = [1, 1]} : vector<3x32xf32> to vector<1x32xf32>
    %33 = vector.broadcast %32 : vector<1x32xf32> to vector<8x32xf32>
    %34 = arith.mulf %31, %33 : vector<8x32xf32>
    %35 = arith.addf %26, %34 : vector<8x32xf32>
    %c1_i32 = arith.constant 1 : i32
    %36 = vector.broadcast %c1_i32 : i32 to vector<8x32xi32>
    %37 = arith.cmpi sge, %25, %36 : vector<8x32xi32>
    %c1_i32_15 = arith.constant 1 : i32
    %38 = tpu.dynamic_rotate %23 by %c1_i32_15 dim 0 : vector<8x32xf32>, i32 -> vector<8x32xf32>
    %cst_16 = arith.constant 0.000000e+00 : f32
    %39 = vector.broadcast %cst_16 : f32 to vector<8x32xf32>
    %40 = arith.select %37, %38, %39 : vector<8x32xi1>, vector<8x32xf32>
    %41 = vector.extract_strided_slice %24 {offsets = [1, 0], sizes = [1, 32], strides = [1, 1]} : vector<3x32xf32> to vector<1x32xf32>
    %42 = vector.broadcast %41 : vector<1x32xf32> to vector<8x32xf32>
    %43 = arith.mulf %40, %42 : vector<8x32xf32>
    %44 = arith.addf %35, %43 : vector<8x32xf32>
    %45 = vector.extract_strided_slice %24 {offsets = [2, 0], sizes = [1, 32], strides = [1, 1]} : vector<3x32xf32> to vector<1x32xf32>
    %46 = vector.broadcast %45 : vector<1x32xf32> to vector<8x32xf32>
    %47 = arith.mulf %23, %46 : vector<8x32xf32>
    %48 = arith.addf %44, %47 : vector<8x32xf32>
    %c0_17 = arith.constant 0 : index
    %c0_18 = arith.constant 0 : index
    %49 = vector.load %arg5[%c0_17, %c0_18] : memref<1x32xf32, #tpu.memory_space<vmem>>, vector<1x32xf32>
    %50 = vector.broadcast %49 : vector<1x32xf32> to vector<8x32xf32>
    %51 = arith.addf %48, %50 : vector<8x32xf32>
    %c0_19 = arith.constant 0 : index
    %c0_20 = arith.constant 0 : index
    %52 = vector.load %arg6[%c0_19, %c0_20] : memref<32x32xf32, #tpu.memory_space<vmem>>, vector<32x32xf32>
    %cst_21 = arith.constant dense<0.000000e+00> : vector<8x32xf32>
    %53 = tpu.matmul %23, %52, %cst_21 {dimension_numbers = #tpu.dot_dimension_numbers<[1], [0], [0], [1], [0, 0, 1, 1], [], []>} : vector<8x32xf32>, vector<32x32xf32>, vector<8x32xf32> -> vector<8x32xf32>
    %c0_22 = arith.constant 0 : index
    %c0_23 = arith.constant 0 : index
    %54 = vector.load %arg7[%c0_22, %c0_23] : memref<1x32xf32, #tpu.memory_space<vmem>>, vector<1x32xf32>
    %55 = vector.broadcast %54 : vector<1x32xf32> to vector<8x32xf32>
    %56 = arith.addf %53, %55 : vector<8x32xf32>
    %57 = arith.mulf %51, %56 : vector<8x32xf32>
    %58 = arith.addf %57, %23 : vector<8x32xf32>
    %c0_24 = arith.constant 0 : index
    %c0_25 = arith.constant 0 : index
    %59 = vector.load %arg8[%c0_24, %c0_25] : memref<32x48xf32, #tpu.memory_space<vmem>>, vector<32x48xf32>
    %cst_26 = arith.constant dense<0.000000e+00> : vector<8x48xf32>
    %60 = tpu.matmul %58, %59, %cst_26 {dimension_numbers = #tpu.dot_dimension_numbers<[1], [0], [0], [1], [0, 0, 1, 1], [], []>} : vector<8x32xf32>, vector<32x48xf32>, vector<8x48xf32> -> vector<8x48xf32>
    %cst_27 = arith.constant 1.000000e+00 : f32
    %61 = vector.broadcast %cst_27 : f32 to vector<8x1xf32>
    %62 = vector.extract_strided_slice %60 {offsets = [0, 0], sizes = [8, 4], strides = [1, 1]} : vector<8x48xf32> to vector<8x4xf32>
    %63 = vector.extract_strided_slice %60 {offsets = [0, 8], sizes = [8, 4], strides = [1, 1]} : vector<8x48xf32> to vector<8x4xf32>
    %64 = vector.extract_strided_slice %60 {offsets = [0, 16], sizes = [8, 16], strides = [1, 1]} : vector<8x48xf32> to vector<8x16xf32>
    %65 = vector.extract_strided_slice %62 {offsets = [0, 0], sizes = [8, 1], strides = [1, 1]} : vector<8x4xf32> to vector<8x1xf32>
    %66 = vector.broadcast %65 : vector<8x1xf32> to vector<8x4xf32>
    %67 = arith.mulf %66, %62 : vector<8x4xf32>
    %68 = vector.extract_strided_slice %62 {offsets = [0, 1], sizes = [8, 1], strides = [1, 1]} : vector<8x4xf32> to vector<8x1xf32>
    %69 = vector.broadcast %68 : vector<8x1xf32> to vector<8x4xf32>
    %70 = arith.mulf %69, %62 : vector<8x4xf32>
    %71 = vector.extract_strided_slice %62 {offsets = [0, 2], sizes = [8, 1], strides = [1, 1]} : vector<8x4xf32> to vector<8x1xf32>
    %72 = vector.broadcast %71 : vector<8x1xf32> to vector<8x4xf32>
    %73 = arith.mulf %72, %62 : vector<8x4xf32>
    %74 = vector.extract_strided_slice %62 {offsets = [0, 3], sizes = [8, 1], strides = [1, 1]} : vector<8x4xf32> to vector<8x1xf32>
    %75 = vector.broadcast %74 : vector<8x1xf32> to vector<8x4xf32>
    %76 = arith.mulf %75, %62 : vector<8x4xf32>
    %77 = tpu.concatenate %67, %70, %73, %76 in 1 : vector<8x4xf32>, vector<8x4xf32>, vector<8x4xf32>, vector<8x4xf32> -> vector<8x16xf32>
    %78 = vector.extract_strided_slice %63 {offsets = [0, 0], sizes = [8, 1], strides = [1, 1]} : vector<8x4xf32> to vector<8x1xf32>
    %79 = vector.broadcast %78 : vector<8x1xf32> to vector<8x4xf32>
    %80 = arith.mulf %79, %63 : vector<8x4xf32>
    %81 = vector.extract_strided_slice %63 {offsets = [0, 1], sizes = [8, 1], strides = [1, 1]} : vector<8x4xf32> to vector<8x1xf32>
    %82 = vector.broadcast %81 : vector<8x1xf32> to vector<8x4xf32>
    %83 = arith.mulf %82, %63 : vector<8x4xf32>
    %84 = vector.extract_strided_slice %63 {offsets = [0, 2], sizes = [8, 1], strides = [1, 1]} : vector<8x4xf32> to vector<8x1xf32>
    %85 = vector.broadcast %84 : vector<8x1xf32> to vector<8x4xf32>
    %86 = arith.mulf %85, %63 : vector<8x4xf32>
    %87 = vector.extract_strided_slice %63 {offsets = [0, 3], sizes = [8, 1], strides = [1, 1]} : vector<8x4xf32> to vector<8x1xf32>
    %88 = vector.broadcast %87 : vector<8x1xf32> to vector<8x4xf32>
    %89 = arith.mulf %88, %63 : vector<8x4xf32>
    %90 = tpu.concatenate %80, %83, %86, %89 in 1 : vector<8x4xf32>, vector<8x4xf32>, vector<8x4xf32>, vector<8x4xf32> -> vector<8x16xf32>
    %cst_28 = arith.constant 0.707106769 : f32
    %91 = vector.broadcast %cst_28 : f32 to vector<8x4xf32>
    %92 = arith.mulf %62, %91 : vector<8x4xf32>
    %cst_29 = arith.constant 0.353553385 : f32
    %93 = vector.broadcast %cst_29 : f32 to vector<8x16xf32>
    %94 = arith.mulf %77, %93 : vector<8x16xf32>
    %95 = tpu.concatenate %61, %92, %94 in 1 : vector<8x1xf32>, vector<8x4xf32>, vector<8x16xf32> -> vector<8x21xf32>
    %cst_30 = arith.constant 0.707106769 : f32
    %96 = vector.broadcast %cst_30 : f32 to vector<8x4xf32>
    %97 = arith.mulf %63, %96 : vector<8x4xf32>
    %cst_31 = arith.constant 0.353553385 : f32
    %98 = vector.broadcast %cst_31 : f32 to vector<8x16xf32>
    %99 = arith.mulf %90, %98 : vector<8x16xf32>
    %100 = tpu.concatenate %61, %97, %99 in 1 : vector<8x1xf32>, vector<8x4xf32>, vector<8x16xf32> -> vector<8x21xf32>
    %101 = tpu.concatenate %64, %61 in 1 : vector<8x16xf32>, vector<8x1xf32> -> vector<8x17xf32>
    %cst_32 = arith.constant dense<0.000000e+00> : vector<21x17xf32>
    %102 = tpu.matmul %100, %101, %cst_32 {dimension_numbers = #tpu.dot_dimension_numbers<[0], [0], [1], [1], [0, 1, 1, 1], [], []>} : vector<8x21xf32>, vector<8x17xf32>, vector<21x17xf32> -> vector<21x17xf32>
    %cst_33 = arith.constant dense<0.000000e+00> : vector<8x17xf32>
    %103 = tpu.matmul %95, %102, %cst_33 {dimension_numbers = #tpu.dot_dimension_numbers<[1], [0], [0], [1], [0, 0, 1, 1], [], []>} : vector<8x21xf32>, vector<21x17xf32>, vector<8x17xf32> -> vector<8x17xf32>
    %104 = vector.extract_strided_slice %103 {offsets = [0, 0], sizes = [8, 16], strides = [1, 1]} : vector<8x17xf32> to vector<8x16xf32>
    %105 = vector.extract_strided_slice %103 {offsets = [0, 16], sizes = [8, 1], strides = [1, 1]} : vector<8x17xf32> to vector<8x1xf32>
    %cst_34 = arith.constant 9.99999996E-13 : f32
    %106 = vector.broadcast %cst_34 : f32 to vector<8x1xf32>
    %107 = arith.addf %105, %106 : vector<8x1xf32>
    %cst_35 = arith.constant 1.000000e+00 : f32
    %108 = vector.broadcast %cst_35 : f32 to vector<8x1xf32>
    %109 = arith.divf %108, %107 : vector<8x1xf32>
    %110 = vector.broadcast %109 : vector<8x1xf32> to vector<8x16xf32>
    %111 = arith.mulf %104, %110 : vector<8x16xf32>
    %112 = vector.extract_strided_slice %60 {offsets = [0, 4], sizes = [8, 4], strides = [1, 1]} : vector<8x48xf32> to vector<8x4xf32>
    %113 = vector.extract_strided_slice %60 {offsets = [0, 12], sizes = [8, 4], strides = [1, 1]} : vector<8x48xf32> to vector<8x4xf32>
    %114 = vector.extract_strided_slice %60 {offsets = [0, 32], sizes = [8, 16], strides = [1, 1]} : vector<8x48xf32> to vector<8x16xf32>
    %115 = vector.extract_strided_slice %112 {offsets = [0, 0], sizes = [8, 1], strides = [1, 1]} : vector<8x4xf32> to vector<8x1xf32>
    %116 = vector.broadcast %115 : vector<8x1xf32> to vector<8x4xf32>
    %117 = arith.mulf %116, %112 : vector<8x4xf32>
    %118 = vector.extract_strided_slice %112 {offsets = [0, 1], sizes = [8, 1], strides = [1, 1]} : vector<8x4xf32> to vector<8x1xf32>
    %119 = vector.broadcast %118 : vector<8x1xf32> to vector<8x4xf32>
    %120 = arith.mulf %119, %112 : vector<8x4xf32>
    %121 = vector.extract_strided_slice %112 {offsets = [0, 2], sizes = [8, 1], strides = [1, 1]} : vector<8x4xf32> to vector<8x1xf32>
    %122 = vector.broadcast %121 : vector<8x1xf32> to vector<8x4xf32>
    %123 = arith.mulf %122, %112 : vector<8x4xf32>
    %124 = vector.extract_strided_slice %112 {offsets = [0, 3], sizes = [8, 1], strides = [1, 1]} : vector<8x4xf32> to vector<8x1xf32>
    %125 = vector.broadcast %124 : vector<8x1xf32> to vector<8x4xf32>
    %126 = arith.mulf %125, %112 : vector<8x4xf32>
    %127 = tpu.concatenate %117, %120, %123, %126 in 1 : vector<8x4xf32>, vector<8x4xf32>, vector<8x4xf32>, vector<8x4xf32> -> vector<8x16xf32>
    %128 = vector.extract_strided_slice %113 {offsets = [0, 0], sizes = [8, 1], strides = [1, 1]} : vector<8x4xf32> to vector<8x1xf32>
    %129 = vector.broadcast %128 : vector<8x1xf32> to vector<8x4xf32>
    %130 = arith.mulf %129, %113 : vector<8x4xf32>
    %131 = vector.extract_strided_slice %113 {offsets = [0, 1], sizes = [8, 1], strides = [1, 1]} : vector<8x4xf32> to vector<8x1xf32>
    %132 = vector.broadcast %131 : vector<8x1xf32> to vector<8x4xf32>
    %133 = arith.mulf %132, %113 : vector<8x4xf32>
    %134 = vector.extract_strided_slice %113 {offsets = [0, 2], sizes = [8, 1], strides = [1, 1]} : vector<8x4xf32> to vector<8x1xf32>
    %135 = vector.broadcast %134 : vector<8x1xf32> to vector<8x4xf32>
    %136 = arith.mulf %135, %113 : vector<8x4xf32>
    %137 = vector.extract_strided_slice %113 {offsets = [0, 3], sizes = [8, 1], strides = [1, 1]} : vector<8x4xf32> to vector<8x1xf32>
    %138 = vector.broadcast %137 : vector<8x1xf32> to vector<8x4xf32>
    %139 = arith.mulf %138, %113 : vector<8x4xf32>
    %140 = tpu.concatenate %130, %133, %136, %139 in 1 : vector<8x4xf32>, vector<8x4xf32>, vector<8x4xf32>, vector<8x4xf32> -> vector<8x16xf32>
    %cst_36 = arith.constant 0.707106769 : f32
    %141 = vector.broadcast %cst_36 : f32 to vector<8x4xf32>
    %142 = arith.mulf %112, %141 : vector<8x4xf32>
    %cst_37 = arith.constant 0.353553385 : f32
    %143 = vector.broadcast %cst_37 : f32 to vector<8x16xf32>
    %144 = arith.mulf %127, %143 : vector<8x16xf32>
    %145 = tpu.concatenate %61, %142, %144 in 1 : vector<8x1xf32>, vector<8x4xf32>, vector<8x16xf32> -> vector<8x21xf32>
    %cst_38 = arith.constant 0.707106769 : f32
    %146 = vector.broadcast %cst_38 : f32 to vector<8x4xf32>
    %147 = arith.mulf %113, %146 : vector<8x4xf32>
    %cst_39 = arith.constant 0.353553385 : f32
    %148 = vector.broadcast %cst_39 : f32 to vector<8x16xf32>
    %149 = arith.mulf %140, %148 : vector<8x16xf32>
    %150 = tpu.concatenate %61, %147, %149 in 1 : vector<8x1xf32>, vector<8x4xf32>, vector<8x16xf32> -> vector<8x21xf32>
    %151 = tpu.concatenate %114, %61 in 1 : vector<8x16xf32>, vector<8x1xf32> -> vector<8x17xf32>
    %cst_40 = arith.constant dense<0.000000e+00> : vector<21x17xf32>
    %152 = tpu.matmul %150, %151, %cst_40 {dimension_numbers = #tpu.dot_dimension_numbers<[0], [0], [1], [1], [0, 1, 1, 1], [], []>} : vector<8x21xf32>, vector<8x17xf32>, vector<21x17xf32> -> vector<21x17xf32>
    %cst_41 = arith.constant dense<0.000000e+00> : vector<8x17xf32>
    %153 = tpu.matmul %145, %152, %cst_41 {dimension_numbers = #tpu.dot_dimension_numbers<[1], [0], [0], [1], [0, 0, 1, 1], [], []>} : vector<8x21xf32>, vector<21x17xf32>, vector<8x17xf32> -> vector<8x17xf32>
    %154 = vector.extract_strided_slice %153 {offsets = [0, 0], sizes = [8, 16], strides = [1, 1]} : vector<8x17xf32> to vector<8x16xf32>
    %155 = vector.extract_strided_slice %153 {offsets = [0, 16], sizes = [8, 1], strides = [1, 1]} : vector<8x17xf32> to vector<8x1xf32>
    %cst_42 = arith.constant 9.99999996E-13 : f32
    %156 = vector.broadcast %cst_42 : f32 to vector<8x1xf32>
    %157 = arith.addf %155, %156 : vector<8x1xf32>
    %cst_43 = arith.constant 1.000000e+00 : f32
    %158 = vector.broadcast %cst_43 : f32 to vector<8x1xf32>
    %159 = arith.divf %158, %157 : vector<8x1xf32>
    %160 = vector.broadcast %159 : vector<8x1xf32> to vector<8x16xf32>
    %161 = arith.mulf %154, %160 : vector<8x16xf32>
    %162 = tpu.concatenate %111, %161 in 1 : vector<8x16xf32>, vector<8x16xf32> -> vector<8x32xf32>
    %c0_44 = arith.constant 0 : index
    %c0_45 = arith.constant 0 : index
    %163 = vector.load %arg9[%c0_44, %c0_45] : memref<32x32xf32, #tpu.memory_space<vmem>>, vector<32x32xf32>
    %cst_46 = arith.constant dense<0.000000e+00> : vector<8x32xf32>
    %164 = tpu.matmul %162, %163, %cst_46 {dimension_numbers = #tpu.dot_dimension_numbers<[1], [0], [0], [1], [0, 0, 1, 1], [], []>} : vector<8x32xf32>, vector<32x32xf32>, vector<8x32xf32> -> vector<8x32xf32>
    %c0_47 = arith.constant 0 : index
    %c0_48 = arith.constant 0 : index
    %165 = vector.load %arg10[%c0_47, %c0_48] : memref<32x64xf32, #tpu.memory_space<vmem>>, vector<32x64xf32>
    %cst_49 = arith.constant dense<0.000000e+00> : vector<8x64xf32>
    %166 = tpu.matmul %164, %165, %cst_49 {dimension_numbers = #tpu.dot_dimension_numbers<[1], [0], [0], [1], [0, 0, 1, 1], [], []>} : vector<8x32xf32>, vector<32x64xf32>, vector<8x64xf32> -> vector<8x64xf32>
    %c0_50 = arith.constant 0 : index
    %c0_51 = arith.constant 0 : index
    %167 = vector.load %arg11[%c0_50, %c0_51] : memref<1x64xf32, #tpu.memory_space<vmem>>, vector<1x64xf32>
    %168 = vector.broadcast %167 : vector<1x64xf32> to vector<8x64xf32>
    %169 = arith.addf %166, %168 : vector<8x64xf32>
    %cst_52 = arith.constant 5.000000e-01 : f32
    %170 = vector.broadcast %cst_52 : f32 to vector<8x64xf32>
    %171 = arith.mulf %170, %169 : vector<8x64xf32>
    %cst_53 = arith.constant 0.707106769 : f32
    %172 = vector.broadcast %cst_53 : f32 to vector<8x64xf32>
    %173 = arith.mulf %169, %172 : vector<8x64xf32>
    %cst_54 = arith.constant 0.000000e+00 : f32
    %174 = vector.broadcast %cst_54 : f32 to vector<8x64xf32>
    %175 = arith.cmpf oge, %173, %174 : vector<8x64xf32>
    %cst_55 = arith.constant 1.000000e+00 : f32
    %cst_56 = arith.constant -1.000000e+00 : f32
    %176 = vector.broadcast %cst_55 : f32 to vector<8x64xf32>
    %177 = vector.broadcast %cst_56 : f32 to vector<8x64xf32>
    %178 = arith.select %175, %176, %177 : vector<8x64xi1>, vector<8x64xf32>
    %179 = math.absf %173 : vector<8x64xf32>
    %cst_57 = arith.constant 0.327591091 : f32
    %180 = vector.broadcast %cst_57 : f32 to vector<8x64xf32>
    %181 = arith.mulf %180, %179 : vector<8x64xf32>
    %cst_58 = arith.constant 1.000000e+00 : f32
    %182 = vector.broadcast %cst_58 : f32 to vector<8x64xf32>
    %183 = arith.addf %182, %181 : vector<8x64xf32>
    %cst_59 = arith.constant 1.000000e+00 : f32
    %184 = vector.broadcast %cst_59 : f32 to vector<8x64xf32>
    %185 = arith.divf %184, %183 : vector<8x64xf32>
    %cst_60 = arith.constant 1.06140542 : f32
    %186 = vector.broadcast %cst_60 : f32 to vector<8x64xf32>
    %187 = arith.mulf %186, %185 : vector<8x64xf32>
    %cst_61 = arith.constant -1.45315206 : f32
    %188 = vector.broadcast %cst_61 : f32 to vector<8x64xf32>
    %189 = arith.addf %187, %188 : vector<8x64xf32>
    %190 = arith.mulf %189, %185 : vector<8x64xf32>
    %cst_62 = arith.constant 1.42141378 : f32
    %191 = vector.broadcast %cst_62 : f32 to vector<8x64xf32>
    %192 = arith.addf %190, %191 : vector<8x64xf32>
    %193 = arith.mulf %192, %185 : vector<8x64xf32>
    %cst_63 = arith.constant -0.284496725 : f32
    %194 = vector.broadcast %cst_63 : f32 to vector<8x64xf32>
    %195 = arith.addf %193, %194 : vector<8x64xf32>
    %196 = arith.mulf %195, %185 : vector<8x64xf32>
    %cst_64 = arith.constant 0.254829586 : f32
    %197 = vector.broadcast %cst_64 : f32 to vector<8x64xf32>
    %198 = arith.addf %196, %197 : vector<8x64xf32>
    %199 = arith.mulf %198, %185 : vector<8x64xf32>
    %cst_65 = arith.constant 0.000000e+00 : f32
    %200 = vector.broadcast %cst_65 : f32 to vector<8x64xf32>
    %201 = arith.subf %200, %179 : vector<8x64xf32>
    %202 = arith.mulf %201, %179 : vector<8x64xf32>
    %203 = math.exp %202 : vector<8x64xf32>
    %204 = arith.mulf %199, %203 : vector<8x64xf32>
    %cst_66 = arith.constant 1.000000e+00 : f32
    %205 = vector.broadcast %cst_66 : f32 to vector<8x64xf32>
    %206 = arith.subf %205, %204 : vector<8x64xf32>
    %207 = arith.mulf %178, %206 : vector<8x64xf32>
    %cst_67 = arith.constant 1.000000e+00 : f32
    %208 = vector.broadcast %cst_67 : f32 to vector<8x64xf32>
    %209 = arith.addf %208, %207 : vector<8x64xf32>
    %210 = arith.mulf %171, %209 : vector<8x64xf32>
    %c0_68 = arith.constant 0 : index
    %c0_69 = arith.constant 0 : index
    %211 = vector.load %arg12[%c0_68, %c0_69] : memref<64x32xf32, #tpu.memory_space<vmem>>, vector<64x32xf32>
    %cst_70 = arith.constant dense<0.000000e+00> : vector<8x32xf32>
    %212 = tpu.matmul %210, %211, %cst_70 {dimension_numbers = #tpu.dot_dimension_numbers<[1], [0], [0], [1], [0, 0, 1, 1], [], []>} : vector<8x64xf32>, vector<64x32xf32>, vector<8x32xf32> -> vector<8x32xf32>
    %c0_71 = arith.constant 0 : index
    %c0_72 = arith.constant 0 : index
    %213 = vector.load %arg13[%c0_71, %c0_72] : memref<1x32xf32, #tpu.memory_space<vmem>>, vector<1x32xf32>
    %214 = vector.broadcast %213 : vector<1x32xf32> to vector<8x32xf32>
    %215 = arith.addf %212, %214 : vector<8x32xf32>
    %216 = arith.addf %215, %1 : vector<8x32xf32>
    %c0_73 = arith.constant 0 : index
    %c0_74 = arith.constant 0 : index
    %c0_75 = arith.constant 0 : index
    %217 = vector.load %arg14[%c0_73, %c0_74, %c0_75] : memref<1x8x32xf32, #tpu.memory_space<vmem>>, vector<1x8x32xf32>
    %218 = vector.shape_cast %217 : vector<1x8x32xf32> to vector<8x32xf32>
    %219 = vector.shape_cast %216 : vector<8x32xf32> to vector<1x8x32xf32>
    tpu.vector_store %arg14[%c0_73, %c0_74, %c0_75], %219 {strides = array<i32>} : memref<1x8x32xf32, #tpu.memory_space<vmem>>, vector<1x8x32xf32>,
    return
  }
  func.func @transform_0(%arg0: i32) -> (i32, i32, i32) {
    %c0_i32 = arith.constant 0 : i32
    %c0_i32_0 = arith.constant 0 : i32
    %c0_i32_1 = arith.constant 0 : i32
    return %arg0, %c0_i32, %c0_i32_0 : i32, i32, i32
  }
  func.func @transform_1(%arg0: i32) -> (i32, i32) {
    %c0_i32 = arith.constant 0 : i32
    %c0_i32_0 = arith.constant 0 : i32
    %c0_i32_1 = arith.constant 0 : i32
    return %c0_i32, %c0_i32_0 : i32, i32
  }
  func.func @transform_2(%arg0: i32) -> (i32, i32) {
    %c0_i32 = arith.constant 0 : i32
    %c0_i32_0 = arith.constant 0 : i32
    %c0_i32_1 = arith.constant 0 : i32
    return %c0_i32, %c0_i32_0 : i32, i32
  }
  func.func @transform_3(%arg0: i32) -> (i32, i32) {
    %c0_i32 = arith.constant 0 : i32
    %c0_i32_0 = arith.constant 0 : i32
    %c0_i32_1 = arith.constant 0 : i32
    return %c0_i32, %c0_i32_0 : i32, i32
  }
  func.func @transform_4(%arg0: i32) -> (i32, i32) {
    %c0_i32 = arith.constant 0 : i32
    %c0_i32_0 = arith.constant 0 : i32
    %c0_i32_1 = arith.constant 0 : i32
    return %c0_i32, %c0_i32_0 : i32, i32
  }
  func.func @transform_5(%arg0: i32) -> (i32, i32) {
    %c0_i32 = arith.constant 0 : i32
    %c0_i32_0 = arith.constant 0 : i32
    %c0_i32_1 = arith.constant 0 : i32
    return %c0_i32, %c0_i32_0 : i32, i32
  }
  func.func @transform_6(%arg0: i32) -> (i32, i32) {
    %c0_i32 = arith.constant 0 : i32
    %c0_i32_0 = arith.constant 0 : i32
    %c0_i32_1 = arith.constant 0 : i32
    return %c0_i32, %c0_i32_0 : i32, i32
  }
  func.func @transform_7(%arg0: i32) -> (i32, i32) {
    %c0_i32 = arith.constant 0 : i32
    %c0_i32_0 = arith.constant 0 : i32
    %c0_i32_1 = arith.constant 0 : i32
    return %c0_i32, %c0_i32_0 : i32, i32
  }
  func.func @transform_8(%arg0: i32) -> (i32, i32) {
    %c0_i32 = arith.constant 0 : i32
    %c0_i32_0 = arith.constant 0 : i32
    %c0_i32_1 = arith.constant 0 : i32
    return %c0_i32, %c0_i32_0 : i32, i32
  }
  func.func @transform_9(%arg0: i32) -> (i32, i32) {
    %c0_i32 = arith.constant 0 : i32
    %c0_i32_0 = arith.constant 0 : i32
    %c0_i32_1 = arith.constant 0 : i32
    return %c0_i32, %c0_i32_0 : i32, i32
  }
  func.func @transform_10(%arg0: i32) -> (i32, i32) {
    %c0_i32 = arith.constant 0 : i32
    %c0_i32_0 = arith.constant 0 : i32
    %c0_i32_1 = arith.constant 0 : i32
    return %c0_i32, %c0_i32_0 : i32, i32
  }
  func.func @transform_11(%arg0: i32) -> (i32, i32) {
    %c0_i32 = arith.constant 0 : i32
    %c0_i32_0 = arith.constant 0 : i32
    %c0_i32_1 = arith.constant 0 : i32
    return %c0_i32, %c0_i32_0 : i32, i32
  }
  func.func @transform_12(%arg0: i32) -> (i32, i32) {
    %c0_i32 = arith.constant 0 : i32
    %c0_i32_0 = arith.constant 0 : i32
    %c0_i32_1 = arith.constant 0 : i32
    return %c0_i32, %c0_i32_0 : i32, i32
  }
  func.func @transform_13(%arg0: i32) -> (i32, i32, i32) {
    %c0_i32 = arith.constant 0 : i32
    %c0_i32_0 = arith.constant 0 : i32
    %c0_i32_1 = arith.constant 0 : i32
    return %arg0, %c0_i32, %c0_i32_0 : i32, i32, i32
  }
}

</mosaic_0001>

<bundles_post_ra>
// kernel: tpu_custom_call.1
= control target key start
LH: loop header
LB: loop body
LE: loop exit
PB: predicated region body
PF: predicated region fallthrough
CT: control target
= control target key end

     0   :  { %s2702_s0 = inlined_call_operand.hbm [shape: f32[2,8,32], index: 0, kind: input, shape index: {}]   ;;  %s2703_s1 = inlined_call_operand.vmem [shape: f32[1,32], index: 1, kind: input, shape index: {}]   ;;  %s2704_s2 = inlined_call_operand.vmem [shape: f32[1,32], index: 2, kind: input, shape index: {}]   ;;  %s2705_s3 = inlined_call_operand.vmem [shape: f32[3,32], index: 3, kind: input, shape index: {}]   ;;  %s2706_s4 = inlined_call_operand.vmem [shape: f32[1,32], index: 4, kind: input, shape index: {}]   ;;  %s2707_s5 = inlined_call_operand.vmem [shape: f32[32,32], index: 5, kind: input, shape index: {}]   ;;  %s2708_s6 = inlined_call_operand.vmem [shape: f32[1,32], index: 6, kind: input, shape index: {}]   ;;  %s2709_s7 = inlined_call_operand.vmem [shape: f32[32,48], index: 7, kind: input, shape index: {}]   ;;  %s2710_s8 = inlined_call_operand.vmem [shape: f32[32,32], index: 8, kind: input, shape index: {}]   ;;  %s2711_s9 = inlined_call_operand.hbm [shape: f32[32,64], index: 9, kind: input, shape index: {}]   ;;  %s2712_s10 = inlined_call_operand.vmem [shape: f32[1,64], index: 10, kind: input, shape index: {}]   ;;  %s2713_s11 = inlined_call_operand.vmem [shape: f32[64,32], index: 11, kind: input, shape index: {}]   ;;  %s2714_s12 = inlined_call_operand.vmem [shape: f32[1,32], index: 12, kind: input, shape index: {}]   ;;  %s2715_s13 = inlined_call_operand.hbm [shape: f32[2,8,32], index: 13, kind: output, shape index: {}]  }
   0x1   :  { %2724 = sst [smem:[#allocation14_spill]] %s2712_s10 }
   0x2   :  { %2725 = sst [smem:[#allocation15_spill]] %s2714_s12 }
   0x3   :  { %2726 = sst [smem:[#allocation16_spill]] %s2715_s13 }
   0x4   :  { %18 = vsyncpa [#allocation3], 0 }
   0x5   :  { %20 = vsyncpa [#allocation3 + $0x1], 0 }
   0x6   :  { %21 = vsyncpa [#allocation6], 0 }
   0x7   :  { %22 = vsyncpa [#allocation4], 0 }
   0x8   :  { %24 = vsyncpa [#allocation4 + $0x1], 0  ;;  %s2277_s25 = smov 0   ;;  %s2279_s26 = smov 0  }
   0x9   :  { %s2281_s27 = smov 0   ;;  %s2283_s28 = smov 0  }
   0xa LB: > { %2727 = sst [smem:[#allocation11_spill]] %s2153_s25  ;;  %s2298_s29 = sadd.s32 4294967295, %s2165_s28   ;;  %s2165_s28 = sphi %s2283_s28, %s2748_s28   ;;  %s2161_s27 = sphi %s2281_s27, %s2751_s27   ;;  %s2157_s26 = sphi %s2279_s26, %s2750_s26   ;;  %s2153_s25 = sphi %s2277_s25, %s2749_s25  }
   0xb   : > { %s1690_s30 = sadd.s32 4294967294, %s2165_s28   ;;  %p50_p0 = scmp.ne.s32.totalorder %s2157_s26, %s2153_s25 }
   0xc   : > { %p2721_p1 = scmp.eq.s32.totalorder %s2298_s29, 0  ;;  %p332_p3 = scmp.eq.s32.totalorder %s1690_s30, 1 }
   0xd   : > { %p1691_p5 = scmp.ge.s32.totalorder %s2165_s28, 1  ;;  %p339_p7 = scmp.lt.s32.totalorder %s2165_s28, 3 }
   0xe   : > { %p2307_p4 = por %p2721_p1, %p50_p0  ;;  %p2312_p6 = por %p332_p3, %p50_p0 }
   0xf   : > { %p2317_p8 = pnand %p1691_p5, %p339_p7  ;;  %s2167_s17 = smov [#allocation5]  }
  0x10   : > { %s2728_s14 = scalar_select %p2307_p4, 1, 0 }
  0x11   : > { %s2729_s15 = scalar_select %p2312_p6, 1, 0 }
  0x12   : > { %s2731_s16 = scalar_select %p2317_p8, 1, 0 }
  0x13   : > { %2730 = sst [smem:[#allocation12_spill]] %s2729_s15  ;;  %s375_s18 = sshll.u32 %s2167_s17, 4  ;;  %s2321_s18 = int_to_ptr.vmem [resolvable:$true] %s375_s18 }
  0x14   : > { %p1923_p9 = pneg %p2317_p8  ;;  %s2333_s20 = sadd.s32 1, %s2165_s28  }
  0x15   : > { %2733 = sst [smem:[#allocation13_spill]] %s2333_s20  ;;  %s37_s21 = sadd.s32 1, %s2161_s27 }
  0x16   : > { %p2328_p11 = pnand %p1923_p9, %p2721_p1  ;;  %s34_s22 = ssub.s32 %s2165_s28, %s2333_s20 }
  0x17   : > { %s2037_s30 = scalar_lea.hbm %s2711_s9, 512 }
  0x18   : > { %p2038_p12 = scmp.ne.s32.totalorder %s2711_s9, %s2037_s30  ;;  %p2039_p13 = pneg %p2328_p11 }
  0x19   : > { %p2044_p5 = scmp.lt.u32.totalorder %s2037_s30, %s2711_s9 }
  0x1a   : > { %p2040_p0 = pnand %p2039_p13, %p2038_p12 }
  0x1c   : > { %p2041_p3 = pneg %p2040_p0 }
  0x1e   : > { %p2046_p7 = pnand %p2044_p5, %p2041_p3 }
  0x20   : > { %2049 = shalt.err (!%p2046_p7)
}
  0x21   : > { %s2050_s20 = scalar_lea.vmem %s2321_s18, 512  ;;  %p2058_p2 = scmp.lt.s32.totalorder %s2321_s18, %s2321_s18 }
  0x22   : > { %p2051_p9 = scmp.ne.s32.totalorder %s2321_s18, %s2050_s20  ;;  %p2059_p6 = scmp.lt.s32.totalorder %s2050_s20, %s2050_s20 }
  0x24   : > { %p2053_p10 = pnand %p2051_p9, %p2039_p13  ;;  %p2060_p4 = por %p2059_p6, %p2058_p2 }
  0x26   : > { %p2054_p1 = pneg %p2053_p10 }
  0x28   : > { %p2061_p8 = pnand %p2060_p4, %p2054_p1 }
  0x2a   : > { %2064 = shalt.err (!%p2061_p8)
}
  0x2b   : > { %s2168_s15 = smov 128   ;;  %s2169_s13 = smov 8  }
  0x2c   : > { %1926 = dma.hbm_to_vmem [thread:$0]  (!%p2328_p11), %s2711_s9, 512, %s2321_s18, [#allocation6], %s2168_s15, %s2168_s15, %s2169_s13  }
  0x2d   : > { %p35_p2 = scmp.eq.s32.totalorder %s34_s22, 0  ;;  %p44_p1 = scmp.ne.s32.totalorder %s2161_s27, %s2157_s26 }
  0x2e   : > { %p45_p4 = scmp.eq.s32.totalorder %s2165_s28, 0  ;;  %p1936_p6 = scmp.lt.s32.totalorder %s2165_s28, 2 }
  0x2f   : > { %s2364_s20 = scalar_select %p35_p2, %s2161_s27, %s37_s21  }
  0x30   : > { %p46_p8 = por %p45_p4, %p44_p1  ;;  %p2734_p10 = scmp.eq.s32.totalorder %s2298_s29, 1 }
  0x31   : > { %s398_s30 = sand.u32 1, %s2161_s27   ;;  %s1695_s17 = sshll.u32 %s2165_s28, 7 }
  0x32   : > { %p2368_p12 = por %p2734_p10, %p44_p1  ;;  %s1694_s12 = sshll.u32 %s398_s30, 3 }
  0x33   : > { %s2377_s25 = scalar_lea.hbm %s2702_s0, %s1695_s17  ;;  %s402_s18 = scalar_lea.vmem [#allocation2], %s1694_s12 }
  0x34   : > { %s409_s21 = sshll.u32 %s402_s18, 4  ;;  %p2379_p11 = pnand %p1936_p6, %p46_p8  ;;  %s2383_s21 = int_to_ptr.vmem [resolvable:$true] %s409_s21 }
  0x35   : > { %s399_s15 = scalar_lea.sflag [#allocation3], %s398_s30  ;;  %s2065_s13 = scalar_lea.hbm %s2377_s25, 128 }
  0x36   : > { %p2066_p13 = scmp.ne.s32.totalorder %s2377_s25, %s2065_s13  ;;  %p2067_p0 = pneg %p2379_p11 }
  0x37   : > { %s2070_s23 = scalar_lea.hbm %s2702_s0, 256  ;;  %p2071_p7 = scmp.lt.u32.totalorder %s2377_s25, %s2702_s0 }
  0x38   : > { %p2068_p3 = pnand %p2067_p0, %p2066_p13  ;;  %p2072_p9 = scmp.lt.u32.totalorder %s2070_s23, %s2065_s13 }
  0x39   : > { %p2074_p1 = scmp.lt.u32.totalorder %s2065_s13, %s2377_s25 }
  0x3a   : > { %p2069_p5 = pneg %p2068_p3  ;;  %p2073_p2 = por %p2072_p9, %p2071_p7 }
  0x3c   : > { %p2075_p4 = por %p2074_p1, %p2073_p2 }
  0x3e   : > { %p2076_p6 = pnand %p2075_p4, %p2069_p5 }
  0x40   : > { %2079 = shalt.err (!%p2076_p6)
}
  0x41   : > { %s2080_s30 = scalar_lea.vmem %s2383_s21, 128  ;;  %s2170_s18 = smov [#allocation2]  }
  0x42   : > { %p2081_p8 = scmp.ne.s32.totalorder %s2383_s21, %s2080_s30  ;;  %s2085_s10 = sshll.u32 %s2170_s18, 4  ;;  %s2086_s10 = int_to_ptr.vmem [resolvable:$false] %s2085_s10 }
  0x43   : > { %s2087_s12 = scalar_lea.vmem %s2086_s10, 256  ;;  %p2088_p3 = scmp.lt.s32.totalorder %s2383_s21, %s2086_s10 }
  0x44   : > { %p2083_p10 = pnand %p2081_p8, %p2067_p0  ;;  %p2089_p7 = scmp.lt.s32.totalorder %s2087_s12, %s2080_s30 }
  0x46   : > { %p2084_p13 = pneg %p2083_p10  ;;  %p2090_p9 = por %p2089_p7, %p2088_p3 }
  0x48   : > { %p2091_p2 = pnand %p2090_p9, %p2084_p13 }
  0x4a   : > { %2094 = shalt.err (!%p2091_p2)
}
  0x4b   : > { %1930 = dma.hbm_to_vmem [thread:$0]  (!%p2379_p11), %s2377_s25, 128, %s2383_s21, %s399_s15  }
  0x4c   : > { %p2737_p5 = scmp.ne.s32.totalorder %s2731_s16, 0 }
  0x4d   : > { %s2413_s13 = sand.u32 (!%p2737_p5), 1, %s2157_s26   ;;  %p2738_p0 = scmp.ne.s32.totalorder (!%p2737_p5), %s2728_s14, 0 }
  0x4e   : > { %418 = sbr.rel (%p2737_p5) target bundleno = 3049 (0xbe9), region = 72  ;;  %s1697_s23 = sshll.u32 (!%p2737_p5), %s2413_s13, 3 }
  0x4f   : > { %s421_s17 = scalar_lea.sflag (!%p2737_p5), [#allocation3], %s2413_s13  ;;  %s424_s19 = scalar_lea.vmem (!%p2737_p5), [#allocation2], %s1697_s23 }
  0x55   : > { %2140 = dma.done.wait (%p2738_p0), %s421_s17, 128  }
  0x56   : > { %2142 = vsyncadd (%p2738_p0), %s421_s17, 4294967168  ;;  %p2739_p11 = scmp.eq.s32.totalorder %s2298_s29, 0 }
  0x58   : > { %2144 = dma.done.wait (%p2739_p11), [#allocation6], 512   ;;  %p2740_p1 = pmov %p2739_p11 }
  0x59   : > { %vm472_vm0 = vcmask 261120   ;;  %v2427_v0 = vld [vmem:[%s424_s19] sm:$0xff]  ;;  %v2171_v10 = vmov 0.0|0.0   ;;  %v540_v11 = vld [vmem:[%s2707_s5 + $0x10] sm:$0xff]  ;;  %v541_v12 = vld [vmem:[%s2707_s5 + $0x18] sm:$0xff]  ;;  %vm2172_vm1 = vmmov 0   ;;  %v504_v32 = vlaneseq }
  0x5a   : > { %2146 = vsyncadd (%p2740_p1), [#allocation6], 4294966784  ;;  %v473_v1 = vsel %vm472_vm0, %v2427_v0, 0.0  ;;  %v538_v7 = vld [vmem:[%s2707_s5] sm:$0xff]  ;;  %v539_v8 = vld [vmem:[%s2707_s5 + $0x8] sm:$0xff]  ;;  %1873 = vmatprep.subr.bf16.mxu0 %v2171_v10  ;;  %1885 = vmatprep.subr.bf16.mxu1 %v2171_v10  ;;  %v1877_v13 = vpack.c.bf16 %v541_v12, %v540_v11  ;;  %v2173_v14 = vmov 0.0  }
  0x5b   : > { %474 = vadd.xlane.f32.xlu0 %v473_v1  ;;  %v1874_v9 = vpack.c.bf16 %v539_v8, %v538_v7  ;;  %1778 = vmatprep.mubr.msk.f32.mxu0 %vm2172_vm1, %v2173_v14  ;;  %v1700_v19 = vld [vmem:[%s2703_s1] ss:$0 sm:$0xff]  ;;  %v625_v25 = vld [vmem:[%s2709_s7 + $0x8] sm:$0xff]  ;;  %v626_v27 = vld [vmem:[%s2709_s7 + $0x10] sm:$0xff]  ;;  %v2174_v30 = vmov 11   ;;  %v2175_v31 = vmov 8  }
  0x5c   : > { %1809 = vmatprep.mubr.msk.f32.mxu1 %vm2172_vm1, %v2173_v14  ;;  %v1701_v21 = vld [vmem:[%s2704_s2] ss:$0 sm:$0xff]  ;;  %v627_v28 = vld [vmem:[%s2709_s7 + $0x18] sm:$0xff]  ;;  %2011 = vset.pattern.permute.xlu0 %v2174_v30  ;;  %v505_v33 = vshrl.u32 %v504_v32, 7  ;;  %v2176_v60 = vmov 12   ;;  %v2177_v61 = vmov 9  }
  0x5d   : > { %1875 = vmatpush3.bf16.msra.mxu0 %v1874_v9  ;;  %v624_v24 = vld [vmem:[%s2709_s7] sm:$0xff]  ;;  %v1883_v29 = vpack.c.bf16 %v627_v28, %v626_v27  ;;  %2009 = vset.pattern.permute.xlu1 %v2175_v31  ;;  %v2178_v62 = vmov 13   ;;  %v2179_v63 = vmov 10   ;;  %v2180_v1 = vmov 14   ;;  %s2185_s25 = smov 120   ;;  %s2186_s21 = smov 116  }
  0x5e   : > { %1876 = vmatprep.subr.bf16.mxu0 %v2171_v10  ;;  %v1880_v26 = vpack.c.bf16 %v625_v25, %v624_v24  ;;  %v511_v34 = vsub.s32 0, %v505_v33  ;;  %v520_v35 = vsub.s32 1, %v505_v33  ;;  %vm506_vm2 = vcmp.ge.s32.totalorder %v505_v33, 2  ;;  %v503_v38 = vld [vmem:[%s2705_s3] sm:$0x7]  ;;  %s2187_s22 = smov 124  }
  0x5f   : > { %vm515_vm3 = vcmp.ge.s32.totalorder %v505_v33, 1  ;;  %v526_v43 = vsub.s32 2, %v505_v33  ;;  %v1702_v50 = vld [vmem:[%s2706_s4] ss:$0 sm:$0xff]  ;;  %s2188_s15 = smov 4   ;;  %s2189_s30 = smov 121  }
  0x60   : > { %v512_v39 = vrot.slane %v503_v38, %v511_v34  ;;  %v521_v40 = vrot.slane %v503_v38, %v520_v35  ;;  %v1703_v51 = vld [vmem:[%s2708_s6] ss:$0 sm:$0xff]  ;;  %s2190_s18 = smov 12   ;;  %vm734_vm4 = vcmask 31744   ;;  %vm736_vm5 = vcmask 64512   ;;  %s2191_s10 = smov 5  }
  0x61   : > { %1878 = vmatpush3.bf16.msra.mxu0 %v1877_v13  ;;  %v527_v46 = vrot.slane %v503_v38, %v526_v43  ;;  %vm738_vm6 = vcmask 97280   ;;  %s2192_s12 = smov 112   ;;  %vm785_vm7 = vcmask 7168   ;;  %vm787_vm8 = vcmask 39936   ;;  %s2195_s17 = smov 8  }
  0x62   : > { %1879 = vmatprep.subr.bf16.mxu0 %v2171_v10  ;;  %vm802_vm9 = vcmask 130048   ;;  %s2196_s19 = smov 117   ;;  %s2197_s14 = smov 1   ;;  %vm929_vm10 = vcmask 1044480   ;;  %vm925_vm11 = vcmask 171008   ;;  %vm1520_vm13 = vcmask 523264  }
  0x63   : > { %s2198_s16 = smov 96  }
  0xe8   : > { %v475_v2 = vpop.xlane.xlu0 %474 }
  0xe9   : > { %v477_v3 = vmul.f32 0.03125, %v475_v2  ;;  %v2181_v2 = vmov 1  }
  0xeb   : > { %v478_v4 = vsub.f32 %v2427_v0, %v477_v3  ;;  %v2182_v3 = vmov 3  }
  0xed   : > { %v479_v5 = vmul.f32 %v478_v4, %v478_v4 }
  0xef   : > { %v480_v6 = vsel %vm472_vm0, %v479_v5, 0.0  ;;  %v2184_v5 = vmov 0  }
  0xf0   : > { %481 = vadd.xlane.f32.xlu0 %v480_v6 }
 0x17d   : > { %v482_v15 = vpop.xlane.xlu0 %481 }
 0x17e   : > { %v483_v16 = vmul.f32 0.03125, %v482_v15 }
 0x180   : > { %v484_v17 = vadd.f32 1e-05, %v483_v16 }
 0x182   : > { %2027 = vrsqrt.f32 %v484_v17 }
 0x18c   : > { %v2028_v18 = vpop.eup %2027 }
 0x18d   : > { %v486_v20 = vmul.f32 %v2028_v18, %v478_v4  ;;  %v2183_v4 = vmov 15  }
 0x18f   : > { %v494_v22 = vmul.f32 %v1700_v19, %v486_v20 }
 0x191   : > { %v502_v23 = vadd.f32 %v1701_v21, %v494_v22 }
 0x193   : > { %1779 = vmatmul.mubr.msk.f32.vlgmr.msra.gmra.mrb[0].mxu0 %vm472_vm0, %v502_v23  ;;  %v507_v36 = vrot.slane %v502_v23, 6  ;;  %v516_v37 = vrot.slane %v502_v23, 7  ;;  %v528_v48 = vmul.f32 %v527_v46, %v502_v23 }
 0x194   : > { %1789 = vmatprep.mubr.msk.f32.mxu0 %vm2172_vm1, %v2173_v14  ;;  %1881 = vmatpush3.bf16.msra.mxu0 %v1880_v26 }
 0x195   : > { %1882 = vmatprep.subr.bf16.mxu0 %v2171_v10  ;;  %v508_v41 = vsel %vm506_vm2, %v507_v36, 0.0  ;;  %v517_v42 = vsel %vm515_vm3, %v516_v37, 0.0 }
 0x196   : > { %v513_v44 = vmul.f32 %v512_v39, %v508_v41  ;;  %v522_v45 = vmul.f32 %v521_v40, %v517_v42 }
 0x198   : > { %1884 = vmatpush3.bf16.msra.mxu0 %v1883_v29  ;;  %v523_v47 = vadd.f32 %v522_v45, %v513_v44 }
 0x199   : > { %1792 = vmatprep.subr.mxu0 %v2173_v14 }
 0x19a   : > { %v529_v49 = vadd.f32 %v528_v48, %v523_v47 }
 0x19c   : > { %v537_v53 = vadd.f32 %v1702_v50, %v529_v49  ;;  %v2193_v49 = vmov 2   ;;  %v2194_v50 = vmov 4  }
 0x266   : > { %v618_v52 = vpop.f32.mrb[0].mxu0 }
 0x267   : > { %v619_v54 = vadd.f32 %v1703_v51, %v618_v52  ;;  %v1780_v55 = vpop.f32.mrb[1].mxu0 }
 0x269   : > { %v622_v56 = vmul.f32 %v619_v54, %v537_v53 }
 0x26b   : > { %v623_v57 = vadd.f32 %v622_v56, %v502_v23  ;;  %v2199_v56 = vmov 6  }
 0x26d   : > { %1790 = vmatmul.mubr.msk.f32.vlgmr.msra.gmra.mrb[2].mxu0 %vm472_vm0, %v623_v57  ;;  %v2200_v57 = vmov 7  }
 0x26e   : > { %1794 = vmatprep.mubr.msk.f32.mxu0 %vm2172_vm1, %v2173_v14 }
 0x340   : > { %v2488_v58 = vpop.f32.mrb[2].mxu0 }
 0x341   : > { %756 = vperm.xlu0 %2011, %v2488_v58   ;;  %741 = vperm.xlu1 %2009, %v2488_v58   ;;  %v1791_v59 = vpop.f32.mrb[3].mxu0  ;;  %v2508_v18 = vmul.f32 0.70710677, %v2488_v58 }
 0x342   : > { %v2201_v59 = vmov 5  }
 0x345   : > { %2013 = vset.pattern.permute.xlu0 %v2176_v60  ;;  %2010 = vset.pattern.permute.xlu1 %v2177_v61 }
 0x346   : > { %1048 = vperm.xlu0 %2013, %v2488_v58   ;;  %746 = vperm.xlu1 %2010, %v2488_v58  }
 0x34a   : > { %2014 = vset.pattern.permute.xlu0 %v2178_v62  ;;  %2012 = vset.pattern.permute.xlu1 %v2179_v63 }
 0x34b   : > { %1053 = vperm.xlu0 %2014, %v2488_v58   ;;  %751 = vperm.xlu1 %2012, %v2488_v58  }
 0x34f   : > { %2015 = vset.pattern.permute.xlu0 %v2180_v1 }
 0x350   : > { %1058 = vperm.xlu0 %2015, %v2488_v58  }
 0x354   : > { %2016 = vset.pattern.permute.xlu0 %v2181_v2 }
 0x355   : > { %708 = vperm.xlu0 %2016, %v2488_v58  }
 0x359   : > { %2018 = vset.pattern.permute.xlu0 %v2182_v3 }
 0x35a   : > { %718 = vperm.xlu0 %2018, %v2488_v58  }
 0x35e   : > { %2019 = vset.pattern.permute.xlu0 %v2183_v4 }
 0x35f   : > { %1063 = vperm.xlu0 %2019, %v2488_v58  }
 0x363   : > { %2020 = vset.pattern.permute.xlu0 %v2184_v5 }
 0x3c0   : > { %v757_v6 = vpop.permute.xlu0 %756  ;;  %v742_v7 = vpop.permute.xlu1 %741 }
 0x3c1   : > { %v744_v8 = vmul.f32 %v742_v7, %v2488_v58  ;;  %v759_v15 = vmul.f32 %v757_v6, %v2488_v58 }
 0x3c3   : > { %761 = vrot.lane.b32.xlu1 %v744_v8, %s2185_s25 }
 0x3c5   : > { %v1049_v9 = vpop.permute.xlu0 %1048  ;;  %v747_v11 = vpop.permute.xlu1 %746 }
 0x3c6   : > { %v1051_v12 = vmul.f32 %v1049_v9, %v2488_v58  ;;  %v749_v13 = vmul.f32 %v747_v11, %v2488_v58 }
 0x3c8   : > { %1068 = vrot.lane.b32.xlu0 %v1051_v12, %s2186_s21  ;;  %765 = vrot.lane.b32.xlu1 %v749_v13, %s2187_s22  ;;  %s2743_s21 = sld [smem:[#allocation16_spill]] }
 0x3ca   : > { %v1054_v16 = vpop.permute.xlu0 %1053  ;;  %v752_v25 = vpop.permute.xlu1 %751 }
 0x3cb   : > { %v1056_v17 = vmul.f32 %v1054_v16, %v2488_v58  ;;  %v754_v31 = vmul.f32 %v752_v25, %v2488_v58 }
 0x3cc   : > { %769 = vrot.lane.b32.xlu1 %v759_v15, %s2188_s15 }
 0x3cd   : > { %1072 = vrot.lane.b32.xlu0 %v1056_v17, %s2185_s25  ;;  %s2202_s25 = smov 125  }
 0x3cf   : > { %v1059_v19 = vpop.permute.xlu0 %1058 }
 0x3d0   : > { %v1061_v20 = vmul.f32 %v1059_v19, %v2488_v58  ;;  %790 = vrot.lane.b32.xlu1 %v2508_v18, %s2189_s30  ;;  %s2741_s30 = sld [smem:[#allocation14_spill]] }
 0x3d2   : > { %1076 = vrot.lane.b32.xlu0 %v1061_v20, %s2187_s22 }
 0x3d4   : > { %v709_v21 = vpop.permute.xlu0 %708 }
 0x3d5   : > { %v711_v22 = vmul.f32 %v709_v21, %v2488_v58 }
 0x3d6   : > { %703 = vperm.xlu0 %2020, %v2488_v58  }
 0x3d9   : > { %v719_v23 = vpop.permute.xlu0 %718 }
 0x3da   : > { %v721_v24 = vmul.f32 %v719_v23, %v2488_v58 }
 0x3dc   : > { %731 = vrot.lane.b32.xlu0 %v721_v24, %s2190_s18 }
 0x3de   : > { %v1064_v27 = vpop.permute.xlu0 %1063 }
 0x3df   : > { %v1066_v37 = vmul.f32 %v1064_v27, %v2488_v58 }
 0x435   : > { %v762_v26 = vpop.permute.xlu1 %761 }
 0x43a   : > { %v1069_v28 = vpop.permute.xlu0 %1068  ;;  %v766_v29 = vpop.permute.xlu1 %765 }
 0x43b   : > { %v772_v30 = vsel %vm734_vm4, %v762_v26, %v766_v29 }
 0x43c   : > { %v773_v32 = vsel %vm736_vm5, %v772_v30, %v754_v31 }
 0x43e   : > { %v770_v33 = vpop.permute.xlu1 %769 }
 0x43f   : > { %v774_v34 = vsel %vm738_vm6, %v773_v32, %v770_v33  ;;  %v1073_v35 = vpop.permute.xlu0 %1072 }
 0x440   : > { %v789_v36 = vmul.f32 0.35355338, %v774_v34  ;;  %v1079_v38 = vsel %vm734_vm4, %v1069_v28, %v1073_v35 }
 0x442   : > { %794 = vrot.lane.b32.xlu1 %v789_v36, %s2191_s10  ;;  %v791_v43 = vpop.permute.xlu1 %790 }
 0x443   : > { %v797_v44 = vsel %vm785_vm7, 1.0, %v791_v43 }
 0x444   : > { %v1077_v39 = vpop.permute.xlu0 %1076 }
 0x445   : > { %v1080_v40 = vsel %vm736_vm5, %v1079_v38, %v1077_v39 }
 0x446   : > { %v1081_v41 = vsel %vm738_vm6, %v1080_v40, %v1066_v37  ;;  %799 = vrot.lane.b32.xlu1 %v2488_v58, %s2192_s12  ;;  %s2742_s12 = sld [smem:[#allocation15_spill]] }
 0x447   : > { %v1092_v42 = vmul.f32 0.35355338, %v1081_v41 }
 0x449   : > { %1097 = vrot.lane.b32.xlu0 %v1092_v42, %s2191_s10 }
 0x455   : > { %v704_v60 = vpop.permute.xlu0 %703 }
 0x456   : > { %v706_v62 = vmul.f32 %v704_v60, %v2488_v58 }
 0x459   : > { %v732_v2 = vpop.permute.xlu0 %731 }
 0x4b4   : > { %v795_v45 = vpop.permute.xlu1 %794 }
 0x4b5   : > { %v798_v46 = vsel %vm787_vm8, %v797_v44, %v795_v45 }
 0x4b6   : > { %804 = vxpose.xlu1.b32.start.end [1/1] (short) (narrow) %v798_v46, 24 }
 0x4b8   : > { %v800_v47 = vpop.permute.xlu1 %799 }
 0x4b9   : > { %v803_v48 = vsel %vm802_vm9, %v800_v47, 1.0 }
 0x4ba   : > { %1793 = vmatpush3.msra.mxu0 %v803_v48 }
 0x4bb   : > { %1888 = vmatprep.subr.bf16.mxu0 %v2171_v10  ;;  %v1098_v13 = vpop.permute.xlu0 %1097 }
 0x4d4   : > { %2017 = vset.pattern.permute.xlu1 %v2193_v49 }
 0x4dc   : > { %713 = vperm.xlu1 %2017, %v2488_v58  }
 0x4e0   : > { %723 = vrot.lane.b32.xlu1 %v711_v22, %s2188_s15 }
 0x4e1   : > { %2021 = vset.pattern.permute.xlu1 %v2194_v50 }
 0x536   : > { %v820_v51 = vpop.trf.xlu1 }
 0x537   : > { %1795 = vmatmul.mubr.msk.f32.vlgmr.msra.gmra.mrb[4].mxu0 %vm736_vm5, %v820_v51 }
 0x538   : > { %1797 = vmatprep.mubr.msk.f32.mxu0 %vm2172_vm1, %v2173_v14 }
 0x53a   : > { %v821_v52 = vpop.trf.xlu1 }
 0x53b   : > { %1798 = vmatmul.mubr.msk.f32.gmra.mrb[6].mxu0 %vm736_vm5, %v821_v52 }
 0x53c   : > { %1800 = vmatprep.mubr.msk.f32.mxu0 %vm2172_vm1, %v2173_v14 }
 0x53e   : > { %v822_v53 = vpop.trf.xlu1 }
 0x53f   : > { %1801 = vmatmul.mubr.msk.f32.gmra.mrb[8].mxu0 %vm736_vm5, %v822_v53 }
 0x540   : > { %1829 = vmatprep.mubr.msk.f32.mxu0 %vm2172_vm1, %v2173_v14 }
 0x55b   : > { %v714_v54 = vpop.permute.xlu1 %713 }
 0x55c   : > { %v716_v55 = vmul.f32 %v714_v54, %v2488_v58 }
 0x55e   : > { %727 = vrot.lane.b32.xlu1 %v716_v55, %s2195_s17  ;;  %v2203_v55 = vmov 16  }
 0x55f   : > { %v724_v61 = vpop.permute.xlu1 %723 }
 0x560   : > { %v735_v63 = vsel %vm734_vm4, %v706_v62, %v724_v61 }
 0x562   : > { %1093 = vrot.lane.b32.xlu1 %v2508_v18, %s2196_s19  ;;  %s2204_s19 = smov 16  }
 0x566   : > { %778 = vrot.lane.b32.xlu1 %v2508_v18, %s2197_s14 }
 0x56a   : > { %1102 = vrot.lane.b32.xlu1 %v2488_v58, %s2198_s16 }
 0x56e   : > { %1013 = vperm.xlu1 %2021, %v2488_v58  }
 0x572   : > { %2022 = vset.pattern.permute.xlu1 %v2199_v56 }
 0x573   : > { %1023 = vperm.xlu1 %2022, %v2488_v58  }
 0x577   : > { %2023 = vset.pattern.permute.xlu1 %v2200_v57 }
 0x578   : > { %1028 = vperm.xlu1 %2023, %v2488_v58  }
 0x57c   : > { %2024 = vset.pattern.permute.xlu1 %v2201_v59 }
 0x57d   : > { %1018 = vperm.xlu1 %2024, %v2488_v58  }
 0x581   : > { %2025 = vset.pattern.permute.xlu1 %v2203_v55 }
 0x5d0   : > { %v728_v1 = vpop.permute.xlu1 %727 }
 0x5d1   : > { %v737_v3 = vsel %vm736_vm5, %v735_v63, %v728_v1  ;;  %v1317_v63 = vld [vmem:[%s2710_s8] sm:$0xff]  ;;  %v1318_v1 = vld [vmem:[%s2710_s8 + $0x8] sm:$0xff] }
 0x5d2   : > { %v739_v4 = vsel %vm738_vm6, %v737_v3, %v732_v2  ;;  %v1319_v2 = vld [vmem:[%s2710_s8 + $0x10] sm:$0xff]  ;;  %v1892_v3 = vpack.c.bf16 %v1318_v1, %v1317_v63 }
 0x5d3   : > { %v776_v5 = vmul.f32 0.35355338, %v739_v4  ;;  %v1320_v4 = vld [vmem:[%s2710_s8 + $0x18] sm:$0xff] }
 0x5d4   : > { %v1094_v6 = vpop.permute.xlu1 %1093 }
 0x5d5   : > { %782 = vrot.lane.b32.xlu0 %v776_v5, %s2191_s10  ;;  %v1100_v12 = vsel %vm785_vm7, 1.0, %v1094_v6  ;;  %v1895_v5 = vpack.c.bf16 %v1320_v4, %v1319_v2  ;;  %v1394_v6 = vld [vmem:[#allocation5] sm:$0xff] }
 0x5d6   : > { %v1101_v16 = vsel %vm787_vm8, %v1100_v12, %v1098_v13 }
 0x5d8   : > { %v779_v7 = vpop.permute.xlu1 %778 }
 0x5d9   : > { %v786_v28 = vsel %vm785_vm7, 1.0, %v779_v7  ;;  %v1395_v7 = vld [vmem:[#allocation5 + $0x8] sm:$0xff] }
 0x5dc   : > { %v1103_v8 = vpop.permute.xlu1 %1102 }
 0x5dd   : > { %v1105_v31 = vsel %vm802_vm9, %v1103_v8, 1.0  ;;  %v1396_v8 = vld [vmem:[#allocation5 + $0x10] sm:$0xff] }
 0x5ed   : > { %v1014_v9 = vpop.permute.xlu1 %1013 }
 0x5ee   : > { %v1016_v11 = vmul.f32 %v1014_v9, %v2488_v58  ;;  %v1898_v9 = vpack.c.bf16 %v1395_v7, %v1394_v6 }
 0x5f0   : > { %1033 = vrot.lane.b32.xlu1 %v1016_v11, %s2187_s22  ;;  %v1397_v11 = vld [vmem:[#allocation5 + $0x18] sm:$0xff] }
 0x5f1   : > { %v1901_v12 = vpack.c.bf16 %v1397_v11, %v1396_v8 }
 0x5f2   : > { %v1024_v15 = vpop.permute.xlu1 %1023 }
 0x5f3   : > { %v1026_v17 = vmul.f32 %v1024_v15, %v2488_v58  ;;  %1106 = vxpose.xlu0.b32.start.end [1/1] (short) (narrow) %v1101_v16, 24 }
 0x5f5   : > { %1037 = vrot.lane.b32.xlu1 %v1026_v17, %s2188_s15 }
 0x5f7   : > { %v1029_v19 = vpop.permute.xlu1 %1028 }
 0x5f8   : > { %v1031_v20 = vmul.f32 %v1029_v19, %v2488_v58 }
 0x5fa   : > { %1041 = vrot.lane.b32.xlu1 %v1031_v20, %s2195_s17  ;;  %s1722_s17 = sshll.u32 %s2298_s29, 7  ;;  %s1597_s29 = scalar_lea.sflag [#allocation4], %s2413_s13 }
 0x5fb   : > { %s2657_s22 = scalar_lea.hbm %s2743_s21, %s1722_s17 }
 0x5fc   : > { %v1019_v32 = vpop.permute.xlu1 %1018 }
 0x60a   : > { %v911_v21 = vpop.f32.mrb[4].mxu0 }
 0x60b   : > { %v1796_v22 = vpop.f32.mrb[5].mxu0 }
 0x60e   : > { %v916_v23 = vpop.f32.mrb[6].mxu0 }
 0x60f   : > { %v1886_v24 = vpack.c.bf16 %v916_v23, %v911_v21  ;;  %v1799_v25 = vpop.f32.mrb[7].mxu0  ;;  %v1505_v23 = vld [vmem:[%s2713_s11] sm:$0xff] }
 0x611   : > { %1887 = vmatpush3.bf16.msra.mxu1 %v1886_v24  ;;  %v1506_v24 = vld [vmem:[%s2713_s11 + $0x8] sm:$0xff] }
 0x612   : > { %v921_v26 = vpop.f32.mrb[8].mxu0  ;;  %1807 = vmatprep.subr.mxu1 %v2173_v14  ;;  %v1904_v25 = vpack.c.bf16 %v1506_v24, %v1505_v23 }
 0x613   : > { %v1802_v27 = vpop.f32.mrb[9].mxu0 }
 0x615   : > { %1808 = vmatpush3.msk.msra.mxu1 %vm929_vm10, %v921_v26  ;;  %v1508_v26 = vld [vmem:[%s2713_s11 + $0x18] sm:$0xff] }
 0x616   : > { %1812 = vmatprep.subr.mxu1 %v2173_v14 }
 0x61c   : > { %2026 = vset.pattern.permute.xlu0 %v2203_v55  ;;  %v2205_v55 = vmov -1.0  }
 0x624   : > { %1083 = vrot.lane.b32.xlu0 %v2508_v18, %s2202_s25  ;;  %v1021_v18 = vmul.f32 %v1019_v32, %v2488_v58  ;;  %v1512_v32 = vld [vmem:[%s2713_s11 + $0x38] sm:$0xff] }
 0x647   : > { %v783_v29 = vpop.permute.xlu0 %782 }
 0x648   : > { %v788_v30 = vsel %vm787_vm8, %v786_v28, %v783_v29  ;;  %v1509_v28 = vld [vmem:[%s2713_s11 + $0x20] sm:$0xff]  ;;  %v1510_v29 = vld [vmem:[%s2713_s11 + $0x28] sm:$0xff] }
 0x649   : > { %1810 = vmatmul.mubr.msk.f32.vlgmr.msra.gmra.mrb[0].mxu1 %vm925_vm11, %v788_v30  ;;  %v1910_v30 = vpack.c.bf16 %v1510_v29, %v1509_v28 }
 0x64a   : > { %1813 = vmatpush3.msra.mxu1 %v1105_v31  ;;  %1814 = vmatprep.mubr.msk.f32.mxu1 %vm2172_vm1, %v2173_v14  ;;  %v1511_v31 = vld [vmem:[%s2713_s11 + $0x30] sm:$0xff] }
 0x64b   : > { %1891 = vmatprep.subr.bf16.mxu1 %v2171_v10 }
 0x662   : > { %v1034_v33 = vpop.permute.xlu1 %1033 }
 0x663   : > { %v1044_v35 = vsel %vm734_vm4, %v1034_v33, %v1021_v18  ;;  %v1913_v33 = vpack.c.bf16 %v1512_v32, %v1511_v31 }
 0x667   : > { %v1038_v34 = vpop.permute.xlu1 %1037 }
 0x668   : > { %v1045_v36 = vsel %vm736_vm5, %v1044_v35, %v1038_v34  ;;  %v1717_v34 = vld [vmem:[%s2741_s30] ss:$0 sm:$0xff] }
 0x66c   : > { %v1042_v37 = vpop.permute.xlu1 %1041 }
 0x66d   : > { %v1046_v38 = vsel %vm738_vm6, %v1045_v36, %v1042_v37 }
 0x66e   : > { %v1082_v39 = vmul.f32 0.35355338, %v1046_v38 }
 0x670   : > { %1087 = vrot.lane.b32.xlu1 %v1082_v39, %s2191_s10 }
 0x673   : > { %v1122_v40 = vpop.trf.xlu0 }
 0x674   : > { %1815 = vmatmul.mubr.msk.f32.vlgmr.msra.gmra.mrb[2].mxu1 %vm736_vm5, %v1122_v40 }
 0x675   : > { %1817 = vmatprep.mubr.msk.f32.mxu1 %vm2172_vm1, %v2173_v14  ;;  %1893 = vmatpush3.bf16.msra.mxu1 %v1892_v3 }
 0x676   : > { %1894 = vmatprep.subr.bf16.mxu1 %v2171_v10 }
 0x677   : > { %v1123_v41 = vpop.trf.xlu0 }
 0x678   : > { %1818 = vmatmul.mubr.msk.f32.gmra.mrb[4].mxu1 %vm736_vm5, %v1123_v41 }
 0x679   : > { %1820 = vmatprep.mubr.msk.f32.mxu1 %vm2172_vm1, %v2173_v14  ;;  %1896 = vmatpush3.bf16.msra.mxu1 %v1895_v5 }
 0x67a   : > { %1903 = vmatprep.subr.bf16.mxu1 %v2171_v10 }
 0x67b   : > { %v1124_v58 = vpop.trf.xlu0 }
 0x67c   : > { %1821 = vmatmul.mubr.msk.f32.gmra.mrb[6].mxu1 %vm736_vm5, %v1124_v58 }
 0x67d   : > { %1840 = vmatprep.mubr.msk.f32.mxu1 %vm2172_vm1, %v2173_v14 }
 0x696   : > { %v1084_v49 = vpop.permute.xlu0 %1083 }
 0x697   : > { %v1090_v53 = vsel %vm785_vm7, 1.0, %v1084_v49 }
 0x6e2   : > { %v1088_v50 = vpop.permute.xlu1 %1087 }
 0x6e3   : > { %v1091_v54 = vsel %vm787_vm8, %v1090_v53, %v1088_v50 }
 0x71c   : > { %v999_v42 = vpop.f32.mrb[0].mxu1 }
 0x71d   : > { %v1811_v43 = vpop.f32.mrb[1].mxu1  ;;  %v1003_v60 = vadd.f32 1e-12, %v999_v42 }
 0x747   : > { %v1213_v44 = vpop.f32.mrb[2].mxu1 }
 0x748   : > { %v1816_v45 = vpop.f32.mrb[3].mxu1 }
 0x74b   : > { %v1218_v46 = vpop.f32.mrb[4].mxu1 }
 0x74c   : > { %v1889_v47 = vpack.c.bf16 %v1218_v46, %v1213_v44  ;;  %v1819_v48 = vpop.f32.mrb[5].mxu1 }
 0x74e   : > { %1890 = vmatpush3.bf16.msra.mxu0 %v1889_v47 }
 0x74f   : > { %v1223_v51 = vpop.f32.mrb[6].mxu1  ;;  %1827 = vmatprep.subr.mxu0 %v2173_v14 }
 0x750   : > { %v1822_v52 = vpop.f32.mrb[7].mxu1 }
 0x752   : > { %1828 = vmatpush3.msk.msra.mxu0 %vm929_vm10, %v1223_v51 }
 0x753   : > { %1830 = vmatmul.mubr.msk.f32.vlgmr.msra.gmra.mrb[10].mxu0 %vm925_vm11, %v1091_v54  ;;  %1897 = vmatprep.subr.bf16.mxu0 %v2171_v10 }
 0x754   : > { %1851 = vmatprep.mubr.msk.f32.mxu0 %vm2172_vm1, %v2173_v14  ;;  %1899 = vmatpush3.bf16.msra.mxu0 %v1898_v9 }
 0x755   : > { %1900 = vmatprep.subr.bf16.mxu0 %v2171_v10 }
 0x758   : > { %1902 = vmatpush3.bf16.msra.mxu0 %v1901_v12 }
 0x826   : > { %v1299_v56 = vpop.f32.mrb[10].mxu0 }
 0x827   : > { %v1303_v57 = vadd.f32 1e-12, %v1299_v56  ;;  %v1831_v59 = vpop.f32.mrb[11].mxu0 }
 0x829   : > { %2029 = vrcp.f32 %v1303_v57 }
 0x82a   : > { %2031 = vrcp.f32 %v1003_v60 }
 0x833   : > { %v2030_v61 = vpop.eup %2029 }
 0x834   : > { %1308 = vperm.xlu1 %2025, %v2030_v61   ;;  %v2032_v62 = vpop.eup %2031 }
 0x838   : > { %1008 = vperm.xlu1 %2025, %v2032_v62   ;;  %v1719_v62 = vld [vmem:[%s2742_s12] ss:$0 sm:$0xff] }
 0x8b3   : > { %v1309_v13 = vpop.permute.xlu1 %1308 }
 0x8b4   : > { %v1311_v15 = vmul.f32 %v1309_v13, %v1299_v56 }
 0x8b6   : > { %1313 = vrot.lane.b32.xlu1 %v1311_v15, %s2204_s19  ;;  %s470_s19 = scalar_lea.vmem [#allocation7], %s1697_s23  ;;  %s2206_s23 = smov [#allocation7]  }
 0x8b7   : > { %v1009_v16 = vpop.permute.xlu1 %1008  ;;  %s1610_s14 = sshll.u32 %s470_s19, 4  ;;  %s2099_s30 = sshll.u32 %s2206_s23, 4  ;;  %s2659_s14 = int_to_ptr.vmem [resolvable:$true] %s1610_s14  ;;  %s2100_s30 = int_to_ptr.vmem [resolvable:$false] %s2099_s30 }
 0x8b8   : > { %v1011_v17 = vmul.f32 %v1009_v16, %v999_v42  ;;  %s2095_s15 = scalar_lea.vmem %s2659_s14, 128  ;;  %s2101_s18 = scalar_lea.vmem %s2100_s30, 256 }
 0x8b9   : > { %p2096_p4 = scmp.ne.s32.totalorder %s2659_s14, %s2095_s15  ;;  %p2102_p10 = scmp.lt.s32.totalorder %s2659_s14, %s2100_s30 }
 0x8ba   : > { %p2103_p13 = scmp.lt.s32.totalorder %s2101_s18, %s2095_s15 }
 0x8bb   : > { %p2097_p6 = pnand %p2096_p4, %p2368_p12 }
 0x8bc   : > { %p2104_p3 = por %p2103_p13, %p2102_p10 }
 0x8bd   : > { %p2098_p8 = pneg %p2097_p6 }
 0x8bf   : > { %p2105_p7 = pnand %p2104_p3, %p2098_p8 }
 0x928   : > { %v1314_v19 = vpop.permute.xlu1 %1313 }
 0x929   : > { %v1316_v20 = vsel %vm802_vm9, %v1011_v17, %v1314_v19 }
 0x92a   : > { %1841 = vmatmul.mubr.msk.f32.vlgmr.msra.gmra.mrb[8].mxu1 %vm472_vm0, %v1316_v20 }
 0x92b   : > { %1870 = vmatprep.mubr.msk.f32.mxu1 %vm2172_vm1, %v2173_v14  ;;  %1905 = vmatpush3.bf16.msra.mxu1 %v1904_v25  ;;  %v1507_v14 = vld [vmem:[%s2713_s11 + $0x10] sm:$0xff] }
 0x92c   : > { %1906 = vmatprep.subr.bf16.mxu1 %v2171_v10  ;;  %v1907_v27 = vpack.c.bf16 %v1508_v26, %v1507_v14 }
 0x92f   : > { %1908 = vmatpush3.bf16.msra.mxu1 %v1907_v27 }
 0x930   : > { %1909 = vmatprep.subr.bf16.mxu1 %v2171_v10 }
 0x933   : > { %1911 = vmatpush3.bf16.msra.mxu1 %v1910_v30 }
 0x934   : > { %1912 = vmatprep.subr.bf16.mxu1 %v2171_v10 }
 0x937   : > { %1914 = vmatpush3.bf16.msra.mxu1 %v1913_v33 }
 0x9fd   : > { %v1390_v21 = vpop.f32.mrb[8].mxu1 }
 0x9fe   : > { %v1842_v22 = vpop.f32.mrb[9].mxu1  ;;  %1852 = vmatmul.mubr.msk.f32.vlgmr.msra.gmra.mrb[12].mxu0 %vm472_vm0, %v1390_v21 }
 0xad1   : > { %v1474_v18 = vpop.f32.mrb[12].mxu0 }
 0xad2   : > { %v1475_v35 = vadd.f32 %v1717_v34, %v1474_v18  ;;  %v1853_v36 = vpop.f32.mrb[13].mxu0 }
 0xad4   : > { %v1479_v37 = vmul.f32 0.70710677, %v1475_v35  ;;  %v1478_v59 = vmul.f32 0.5, %v1475_v35 }
 0xad6   : > { %v1482_v38 = vand.u32 2147483647, %v1479_v37  ;;  %vm1480_vm12 = vcmp.ge.f32.partialorder %v1479_v37, 0.0 }
 0xad7   : > { %v1481_v56 = vsel %vm1480_vm12, 1.0, %v2205_v55 }
 0xad8   : > { %v1483_v10 = vmul.f32 0.3275911, %v1482_v38  ;;  %v1496_v40 = vsub.f32 0.0, %v1482_v38 }
 0xada   : > { %v1484_v39 = vadd.f32 1.0, %v1483_v10  ;;  %v1497_v58 = vmul.f32 %v1496_v40, %v1482_v38 }
 0xadc   : > { %2033 = vrcp.f32 %v1484_v39  ;;  %v1498_v44 = vmul.f32 1.442695, %v1497_v58 }
 0xade   : > { %2035 = vpow2.f32 %v1498_v44 }
 0xae6   : > { %v2034_v41 = vpop.eup %2033 }
 0xae7   : > { %v1487_v42 = vmul.f32 1.0614054, %v2034_v41 }
 0xae8   : > { %v2036_v52 = vpop.eup %2035 }
 0xae9   : > { %v1488_v43 = vadd.f32 -1.4531521, %v1487_v42 }
 0xaeb   : > { %v1489_v45 = vmul.f32 %v2034_v41, %v1488_v43 }
 0xaed   : > { %v1490_v46 = vadd.f32 1.4214138, %v1489_v45 }
 0xaef   : > { %v1491_v47 = vmul.f32 %v2034_v41, %v1490_v46 }
 0xaf1   : > { %v1492_v48 = vadd.f32 -0.28449672, %v1491_v47 }
 0xaf3   : > { %v1493_v49 = vmul.f32 %v2034_v41, %v1492_v48 }
 0xaf5   : > { %v1494_v50 = vadd.f32 0.2548296, %v1493_v49 }
 0xaf7   : > { %v1495_v51 = vmul.f32 %v2034_v41, %v1494_v50 }
 0xaf9   : > { %v1500_v53 = vmul.f32 %v2036_v52, %v1495_v51 }
 0xafb   : > { %v1501_v54 = vsub.f32 1.0, %v1500_v53 }
 0xafd   : > { %v1502_v57 = vmul.f32 %v1501_v54, %v1481_v56 }
 0xaff   : > { %v1503_v60 = vadd.f32 1.0, %v1502_v57 }
 0xb01   : > { %v1504_v61 = vmul.f32 %v1503_v60, %v1478_v59 }
 0xb03   : > { %1871 = vmatmul.mubr.msk.f32.vlgmr.msra.gmra.mrb[10].mxu1 %vm1520_vm13, %v1504_v61 }
 0xbd6   : > { %v1590_v63 = vpop.f32.mrb[10].mxu1 }
 0xbd7   : > { %v1591_v1 = vadd.f32 %v1719_v62, %v1590_v63  ;;  %v1872_v2 = vpop.f32.mrb[11].mxu1 }
 0xbd9   : > { %v1594_v3 = vadd.f32 %v1591_v1, %v2427_v0 }
 0xbdb   : > { %1595 = vst.msk [vmem:[%s470_s19] sm:$0xff] %vm472_vm0, %v1594_v3 }
 0xbdc   : > { %2108 = shalt.err (!%p2105_p7)
}
 0xbdd   : > { %s2109_s13 = scalar_lea.hbm %s2657_s22, 128  ;;  %s2113_s17 = scalar_lea.hbm %s2743_s21, 256 }
 0xbde   : > { %p2110_p9 = scmp.ne.s32.totalorder %s2657_s22, %s2109_s13  ;;  %p2114_p0 = scmp.lt.u32.totalorder %s2657_s22, %s2743_s21 }
 0xbdf   : > { %p2115_p11 = scmp.lt.u32.totalorder %s2113_s17, %s2109_s13  ;;  %p2117_p4 = scmp.lt.u32.totalorder %s2109_s13, %s2657_s22 }
 0xbe0   : > { %p2111_p2 = pnand %p2110_p9, %p2368_p12 }
 0xbe1   : > { %p2116_p1 = por %p2115_p11, %p2114_p0 }
 0xbe2   : > { %p2112_p5 = pneg %p2111_p2 }
 0xbe3   : > { %p2118_p6 = por %p2117_p4, %p2116_p1 }
 0xbe5   : > { %p2119_p8 = pnand %p2118_p6, %p2112_p5 }
 0xbe7   : > { %2122 = shalt.err (!%p2119_p8)
}
 0xbe8   : > { %1921 = dma.vmem_to_hbm [thread:$0]  (%p2368_p12), %s2659_s14, 128, %s2657_s22, %s1597_s29  }
 0xbe9 PF: > { %s2744_s25 = sld [smem:[#allocation11_spill]]  ;;  %s2745_s15 = sld [smem:[#allocation12_spill]] }
 0xbea   : > { %p2747_p13 = scmp.ge.s32.totalorder %s2165_s28, 2 }
 0xbef   : > { %s1622_s23 = sand.u32 1, %s2744_s25   ;;  %p2746_p10 = scmp.ne.s32.totalorder %s2745_s15, 0 }
 0xbf0   : > { %s1623_s30 = scalar_lea.sflag [#allocation4], %s1622_s23 }
 0xbf1   : > { %p1932_p3 = pnand %p2747_p13, %p2746_p10 }
 0xbf3   : > { %2148 = dma.done.wait (!%p1932_p3), %s1623_s30, 128  }
 0xbf4   : > { %2150 = vsyncadd (!%p1932_p3), %s1623_s30, 4294967168  ;;  %s2748_s28 = sld [smem:[#allocation13_spill]]  ;;  %s2749_s25 = smov %s2157_s26 }
 0xbf5   : > { %s2750_s26 = smov %s2161_s27  ;;  %s2751_s27 = smov %s2364_s20 }
 0xbfa   : > { %p27_p7 = scmp.ge.s32.totalorder %s2748_s28, 4  }
 0xbfc   :  { %29 = sbr.rel (!%p27_p7) target bundleno = 10 (0xa), region = 121 }
 0xc03   :  { %1628 = vsyncpa [#allocation3], 1 }
 0xc04   :  { %1630 = vsyncpa [#allocation3 + $0x1], 1 }
 0xc05   :  { %1631 = vsyncpa [#allocation6], 1 }
 0xc06   :  { %1632 = vsyncpa [#allocation4], 1 }
 0xc07   :  { %1634 = vsyncpa [#allocation4 + $0x1], 1 }

// kernel: tpu_custom_call.1
= control target key start
LH: loop header
LB: loop body
LE: loop exit
PB: predicated region body
PF: predicated region fallthrough
CT: control target
= control target key end

     0   :  { %s2702_s0 = inlined_call_operand.hbm [shape: f32[2,8,32], index: 0, kind: input, shape index: {}]   ;;  %s2703_s1 = inlined_call_operand.vmem [shape: f32[1,32], index: 1, kind: input, shape index: {}]   ;;  %s2704_s2 = inlined_call_operand.vmem [shape: f32[1,32], index: 2, kind: input, shape index: {}]   ;;  %s2705_s3 = inlined_call_operand.vmem [shape: f32[3,32], index: 3, kind: input, shape index: {}]   ;;  %s2706_s4 = inlined_call_operand.vmem [shape: f32[1,32], index: 4, kind: input, shape index: {}]   ;;  %s2707_s5 = inlined_call_operand.vmem [shape: f32[32,32], index: 5, kind: input, shape index: {}]   ;;  %s2708_s6 = inlined_call_operand.vmem [shape: f32[1,32], index: 6, kind: input, shape index: {}]   ;;  %s2709_s7 = inlined_call_operand.vmem [shape: f32[32,48], index: 7, kind: input, shape index: {}]   ;;  %s2710_s8 = inlined_call_operand.vmem [shape: f32[32,32], index: 8, kind: input, shape index: {}]   ;;  %s2711_s9 = inlined_call_operand.hbm [shape: f32[32,64], index: 9, kind: input, shape index: {}]   ;;  %s2712_s10 = inlined_call_operand.vmem [shape: f32[1,64], index: 10, kind: input, shape index: {}]   ;;  %s2713_s11 = inlined_call_operand.vmem [shape: f32[64,32], index: 11, kind: input, shape index: {}]   ;;  %s2714_s12 = inlined_call_operand.vmem [shape: f32[1,32], index: 12, kind: input, shape index: {}]   ;;  %s2715_s13 = inlined_call_operand.hbm [shape: f32[2,8,32], index: 13, kind: output, shape index: {}]  }
   0x1   :  { %2724 = sst [smem:[#allocation14_spill]] %s2712_s10 }
   0x2   :  { %2725 = sst [smem:[#allocation15_spill]] %s2714_s12 }
   0x3   :  { %2726 = sst [smem:[#allocation16_spill]] %s2715_s13 }
   0x4   :  { %18 = vsyncpa [#allocation3], 0 }
   0x5   :  { %20 = vsyncpa [#allocation3 + $0x1], 0 }
   0x6   :  { %21 = vsyncpa [#allocation6], 0 }
   0x7   :  { %22 = vsyncpa [#allocation4], 0 }
   0x8   :  { %24 = vsyncpa [#allocation4 + $0x1], 0  ;;  %s2277_s25 = smov 0   ;;  %s2279_s26 = smov 0  }
   0x9   :  { %s2281_s27 = smov 0   ;;  %s2283_s28 = smov 0  }
   0xa LB: > { %2727 = sst [smem:[#allocation11_spill]] %s2153_s25  ;;  %s2298_s29 = sadd.s32 4294967295, %s2165_s28   ;;  %s2165_s28 = sphi %s2283_s28, %s2748_s28   ;;  %s2161_s27 = sphi %s2281_s27, %s2751_s27   ;;  %s2157_s26 = sphi %s2279_s26, %s2750_s26   ;;  %s2153_s25 = sphi %s2277_s25, %s2749_s25  }
   0xb   : > { %s1690_s30 = sadd.s32 4294967294, %s2165_s28   ;;  %p50_p0 = scmp.ne.s32.totalorder %s2157_s26, %s2153_s25 }
   0xc   : > { %p2721_p1 = scmp.eq.s32.totalorder %s2298_s29, 0  ;;  %p332_p3 = scmp.eq.s32.totalorder %s1690_s30, 1 }
   0xd   : > { %p1691_p5 = scmp.ge.s32.totalorder %s2165_s28, 1  ;;  %p339_p7 = scmp.lt.s32.totalorder %s2165_s28, 3 }
   0xe   : > { %p2307_p4 = por %p2721_p1, %p50_p0  ;;  %p2312_p6 = por %p332_p3, %p50_p0 }
   0xf   : > { %p2317_p8 = pnand %p1691_p5, %p339_p7  ;;  %s2167_s17 = smov [#allocation5]  }
  0x10   : > { %s2728_s14 = scalar_select %p2307_p4, 1, 0 }
  0x11   : > { %s2729_s15 = scalar_select %p2312_p6, 1, 0 }
  0x12   : > { %s2731_s16 = scalar_select %p2317_p8, 1, 0 }
  0x13   : > { %2730 = sst [smem:[#allocation12_spill]] %s2729_s15  ;;  %s375_s18 = sshll.u32 %s2167_s17, 4  ;;  %s2321_s18 = int_to_ptr.vmem [resolvable:$true] %s375_s18 }
  0x14   : > { %p1923_p9 = pneg %p2317_p8  ;;  %s2333_s20 = sadd.s32 1, %s2165_s28  }
  0x15   : > { %2733 = sst [smem:[#allocation13_spill]] %s2333_s20  ;;  %s37_s21 = sadd.s32 1, %s2161_s27 }
  0x16   : > { %p2328_p11 = pnand %p1923_p9, %p2721_p1  ;;  %s34_s22 = ssub.s32 %s2165_s28, %s2333_s20 }
  0x17   : > { %s2037_s30 = scalar_lea.hbm %s2711_s9, 512 }
  0x18   : > { %p2038_p12 = scmp.ne.s32.totalorder %s2711_s9, %s2037_s30  ;;  %p2039_p13 = pneg %p2328_p11 }
  0x19   : > { %p2044_p5 = scmp.lt.u32.totalorder %s2037_s30, %s2711_s9 }
  0x1a   : > { %p2040_p0 = pnand %p2039_p13, %p2038_p12 }
  0x1c   : > { %p2041_p3 = pneg %p2040_p0 }
  0x1e   : > { %p2046_p7 = pnand %p2044_p5, %p2041_p3 }
  0x20   : > { %2049 = shalt.err (!%p2046_p7)
}
  0x21   : > { %s2050_s20 = scalar_lea.vmem %s2321_s18, 512  ;;  %p2058_p2 = scmp.lt.s32.totalorder %s2321_s18, %s2321_s18 }
  0x22   : > { %p2051_p9 = scmp.ne.s32.totalorder %s2321_s18, %s2050_s20  ;;  %p2059_p6 = scmp.lt.s32.totalorder %s2050_s20, %s2050_s20 }
  0x24   : > { %p2053_p10 = pnand %p2051_p9, %p2039_p13  ;;  %p2060_p4 = por %p2059_p6, %p2058_p2 }
  0x26   : > { %p2054_p1 = pneg %p2053_p10 }
  0x28   : > { %p2061_p8 = pnand %p2060_p4, %p2054_p1 }
  0x2a   : > { %2064 = shalt.err (!%p2061_p8)
}
  0x2b   : > { %s2168_s15 = smov 128   ;;  %s2169_s13 = smov 8  }
  0x2c   : > { %1926 = dma.hbm_to_vmem [thread:$0]  (!%p2328_p11), %s2711_s9, 512, %s2321_s18, [#allocation6], %s2168_s15, %s2168_s15, %s2169_s13  }
  0x2d   : > { %p35_p2 = scmp.eq.s32.totalorder %s34_s22, 0  ;;  %p44_p1 = scmp.ne.s32.totalorder %s2161_s27, %s2157_s26 }
  0x2e   : > { %p45_p4 = scmp.eq.s32.totalorder %s2165_s28, 0  ;;  %p1936_p6 = scmp.lt.s32.totalorder %s2165_s28, 2 }
  0x2f   : > { %s2364_s20 = scalar_select %p35_p2, %s2161_s27, %s37_s21  }
  0x30   : > { %p46_p8 = por %p45_p4, %p44_p1  ;;  %p2734_p10 = scmp.eq.s32.totalorder %s2298_s29, 1 }
  0x31   : > { %s398_s30 = sand.u32 1, %s2161_s27   ;;  %s1695_s17 = sshll.u32 %s2165_s28, 7 }
  0x32   : > { %p2368_p12 = por %p2734_p10, %p44_p1  ;;  %s1694_s12 = sshll.u32 %s398_s30, 3 }
  0x33   : > { %s2377_s25 = scalar_lea.hbm %s2702_s0, %s1695_s17  ;;  %s402_s18 = scalar_lea.vmem [#allocation2], %s1694_s12 }
  0x34   : > { %s409_s21 = sshll.u32 %s402_s18, 4  ;;  %p2379_p11 = pnand %p1936_p6, %p46_p8  ;;  %s2383_s21 = int_to_ptr.vmem [resolvable:$true] %s409_s21 }
  0x35   : > { %s399_s15 = scalar_lea.sflag [#allocation3], %s398_s30  ;;  %s2065_s13 = scalar_lea.hbm %s2377_s25, 128 }
  0x36   : > { %p2066_p13 = scmp.ne.s32.totalorder %s2377_s25, %s2065_s13  ;;  %p2067_p0 = pneg %p2379_p11 }
  0x37   : > { %s2070_s23 = scalar_lea.hbm %s2702_s0, 256  ;;  %p2071_p7 = scmp.lt.u32.totalorder %s2377_s25, %s2702_s0 }
  0x38   : > { %p2068_p3 = pnand %p2067_p0, %p2066_p13  ;;  %p2072_p9 = scmp.lt.u32.totalorder %s2070_s23, %s2065_s13 }
  0x39   : > { %p2074_p1 = scmp.lt.u32.totalorder %s2065_s13, %s2377_s25 }
  0x3a   : > { %p2069_p5 = pneg %p2068_p3  ;;  %p2073_p2 = por %p2072_p9, %p2071_p7 }
  0x3c   : > { %p2075_p4 = por %p2074_p1, %p2073_p2 }
  0x3e   : > { %p2076_p6 = pnand %p2075_p4, %p2069_p5 }
  0x40   : > { %2079 = shalt.err (!%p2076_p6)
}
  0x41   : > { %s2080_s30 = scalar_lea.vmem %s2383_s21, 128  ;;  %s2170_s18 = smov [#allocation2]  }
  0x42   : > { %p2081_p8 = scmp.ne.s32.totalorder %s2383_s21, %s2080_s30  ;;  %s2085_s10 = sshll.u32 %s2170_s18, 4  ;;  %s2086_s10 = int_to_ptr.vmem [resolvable:$false] %s2085_s10 }
  0x43   : > { %s2087_s12 = scalar_lea.vmem %s2086_s10, 256  ;;  %p2088_p3 = scmp.lt.s32.totalorder %s2383_s21, %s2086_s10 }
  0x44   : > { %p2083_p10 = pnand %p2081_p8, %p2067_p0  ;;  %p2089_p7 = scmp.lt.s32.totalorder %s2087_s12, %s2080_s30 }
  0x46   : > { %p2084_p13 = pneg %p2083_p10  ;;  %p2090_p9 = por %p2089_p7, %p2088_p3 }
  0x48   : > { %p2091_p2 = pnand %p2090_p9, %p2084_p13 }
  0x4a   : > { %2094 = shalt.err (!%p2091_p2)
}
  0x4b   : > { %1930 = dma.hbm_to_vmem [thread:$0]  (!%p2379_p11), %s2377_s25, 128, %s2383_s21, %s399_s15  }
  0x4c   : > { %p2737_p5 = scmp.ne.s32.totalorder %s2731_s16, 0 }
  0x4d   : > { %s2413_s13 = sand.u32 (!%p2737_p5), 1, %s2157_s26   ;;  %p2738_p0 = scmp.ne.s32.totalorder (!%p2737_p5), %s2728_s14, 0 }
  0x4e   : > { %418 = sbr.rel (%p2737_p5) target bundleno = 3049 (0xbe9), region = 72  ;;  %s1697_s23 = sshll.u32 (!%p2737_p5), %s2413_s13, 3 }
  0x4f   : > { %s421_s17 = scalar_lea.sflag (!%p2737_p5), [#allocation3], %s2413_s13  ;;  %s424_s19 = scalar_lea.vmem (!%p2737_p5), [#allocation2], %s1697_s23 }
  0x55   : > { %2140 = dma.done.wait (%p2738_p0), %s421_s17, 128  }
  0x56   : > { %2142 = vsyncadd (%p2738_p0), %s421_s17, 4294967168  ;;  %p2739_p11 = scmp.eq.s32.totalorder %s2298_s29, 0 }
  0x58   : > { %2144 = dma.done.wait (%p2739_p11), [#allocation6], 512   ;;  %p2740_p1 = pmov %p2739_p11 }
  0x59   : > { %vm472_vm0 = vcmask 261120   ;;  %v2427_v0 = vld [vmem:[%s424_s19] sm:$0xff]  ;;  %v2171_v10 = vmov 0.0|0.0   ;;  %v540_v11 = vld [vmem:[%s2707_s5 + $0x10] sm:$0xff]  ;;  %v541_v12 = vld [vmem:[%s2707_s5 + $0x18] sm:$0xff]  ;;  %vm2172_vm1 = vmmov 0   ;;  %v504_v32 = vlaneseq }
  0x5a   : > { %2146 = vsyncadd (%p2740_p1), [#allocation6], 4294966784  ;;  %v473_v1 = vsel %vm472_vm0, %v2427_v0, 0.0  ;;  %v538_v7 = vld [vmem:[%s2707_s5] sm:$0xff]  ;;  %v539_v8 = vld [vmem:[%s2707_s5 + $0x8] sm:$0xff]  ;;  %1873 = vmatprep.subr.bf16.mxu0 %v2171_v10  ;;  %1885 = vmatprep.subr.bf16.mxu1 %v2171_v10  ;;  %v1877_v13 = vpack.c.bf16 %v541_v12, %v540_v11  ;;  %v2173_v14 = vmov 0.0  }
  0x5b   : > { %474 = vadd.xlane.f32.xlu0 %v473_v1  ;;  %v1874_v9 = vpack.c.bf16 %v539_v8, %v538_v7  ;;  %1778 = vmatprep.mubr.msk.f32.mxu0 %vm2172_vm1, %v2173_v14  ;;  %v1700_v19 = vld [vmem:[%s2703_s1] ss:$0 sm:$0xff]  ;;  %v625_v25 = vld [vmem:[%s2709_s7 + $0x8] sm:$0xff]  ;;  %v626_v27 = vld [vmem:[%s2709_s7 + $0x10] sm:$0xff]  ;;  %v2174_v30 = vmov 11   ;;  %v2175_v31 = vmov 8  }
  0x5c   : > { %1809 = vmatprep.mubr.msk.f32.mxu1 %vm2172_vm1, %v2173_v14  ;;  %v1701_v21 = vld [vmem:[%s2704_s2] ss:$0 sm:$0xff]  ;;  %v627_v28 = vld [vmem:[%s2709_s7 + $0x18] sm:$0xff]  ;;  %2011 = vset.pattern.permute.xlu0 %v2174_v30  ;;  %v505_v33 = vshrl.u32 %v504_v32, 7  ;;  %v2176_v60 = vmov 12   ;;  %v2177_v61 = vmov 9  }
  0x5d   : > { %1875 = vmatpush3.bf16.msra.mxu0 %v1874_v9  ;;  %v624_v24 = vld [vmem:[%s2709_s7] sm:$0xff]  ;;  %v1883_v29 = vpack.c.bf16 %v627_v28, %v626_v27  ;;  %2009 = vset.pattern.permute.xlu1 %v2175_v31  ;;  %v2178_v62 = vmov 13   ;;  %v2179_v63 = vmov 10   ;;  %v2180_v1 = vmov 14   ;;  %s2185_s25 = smov 120   ;;  %s2186_s21 = smov 116  }
  0x5e   : > { %1876 = vmatprep.subr.bf16.mxu0 %v2171_v10  ;;  %v1880_v26 = vpack.c.bf16 %v625_v25, %v624_v24  ;;  %v511_v34 = vsub.s32 0, %v505_v33  ;;  %v520_v35 = vsub.s32 1, %v505_v33  ;;  %vm506_vm2 = vcmp.ge.s32.totalorder %v505_v33, 2  ;;  %v503_v38 = vld [vmem:[%s2705_s3] sm:$0x7]  ;;  %s2187_s22 = smov 124  }
  0x5f   : > { %vm515_vm3 = vcmp.ge.s32.totalorder %v505_v33, 1  ;;  %v526_v43 = vsub.s32 2, %v505_v33  ;;  %v1702_v50 = vld [vmem:[%s2706_s4] ss:$0 sm:$0xff]  ;;  %s2188_s15 = smov 4   ;;  %s2189_s30 = smov 121  }
  0x60   : > { %v512_v39 = vrot.slane %v503_v38, %v511_v34  ;;  %v521_v40 = vrot.slane %v503_v38, %v520_v35  ;;  %v1703_v51 = vld [vmem:[%s2708_s6] ss:$0 sm:$0xff]  ;;  %s2190_s18 = smov 12   ;;  %vm734_vm4 = vcmask 31744   ;;  %vm736_vm5 = vcmask 64512   ;;  %s2191_s10 = smov 5  }
  0x61   : > { %1878 = vmatpush3.bf16.msra.mxu0 %v1877_v13  ;;  %v527_v46 = vrot.slane %v503_v38, %v526_v43  ;;  %vm738_vm6 = vcmask 97280   ;;  %s2192_s12 = smov 112   ;;  %vm785_vm7 = vcmask 7168   ;;  %vm787_vm8 = vcmask 39936   ;;  %s2195_s17 = smov 8  }
  0x62   : > { %1879 = vmatprep.subr.bf16.mxu0 %v2171_v10  ;;  %vm802_vm9 = vcmask 130048   ;;  %s2196_s19 = smov 117   ;;  %s2197_s14 = smov 1   ;;  %vm929_vm10 = vcmask 1044480   ;;  %vm925_vm11 = vcmask 171008   ;;  %vm1520_vm13 = vcmask 523264  }
  0x63   : > { %s2198_s16 = smov 96  }
  0xe8   : > { %v475_v2 = vpop.xlane.xlu0 %474 }
  0xe9   : > { %v477_v3 = vmul.f32 0.03125, %v475_v2  ;;  %v2181_v2 = vmov 1  }
  0xeb   : > { %v478_v4 = vsub.f32 %v2427_v0, %v477_v3  ;;  %v2182_v3 = vmov 3  }
  0xed   : > { %v479_v5 = vmul.f32 %v478_v4, %v478_v4 }
  0xef   : > { %v480_v6 = vsel %vm472_vm0, %v479_v5, 0.0  ;;  %v2184_v5 = vmov 0  }
  0xf0   : > { %481 = vadd.xlane.f32.xlu0 %v480_v6 }
 0x17d   : > { %v482_v15 = vpop.xlane.xlu0 %481 }
 0x17e   : > { %v483_v16 = vmul.f32 0.03125, %v482_v15 }
 0x180   : > { %v484_v17 = vadd.f32 1e-05, %v483_v16 }
 0x182   : > { %2027 = vrsqrt.f32 %v484_v17 }
 0x18c   : > { %v2028_v18 = vpop.eup %2027 }
 0x18d   : > { %v486_v20 = vmul.f32 %v2028_v18, %v478_v4  ;;  %v2183_v4 = vmov 15  }
 0x18f   : > { %v494_v22 = vmul.f32 %v1700_v19, %v486_v20 }
 0x191   : > { %v502_v23 = vadd.f32 %v1701_v21, %v494_v22 }
 0x193   : > { %1779 = vmatmul.mubr.msk.f32.vlgmr.msra.gmra.mrb[0].mxu0 %vm472_vm0, %v502_v23  ;;  %v507_v36 = vrot.slane %v502_v23, 6  ;;  %v516_v37 = vrot.slane %v502_v23, 7  ;;  %v528_v48 = vmul.f32 %v527_v46, %v502_v23 }
 0x194   : > { %1789 = vmatprep.mubr.msk.f32.mxu0 %vm2172_vm1, %v2173_v14  ;;  %1881 = vmatpush3.bf16.msra.mxu0 %v1880_v26 }
 0x195   : > { %1882 = vmatprep.subr.bf16.mxu0 %v2171_v10  ;;  %v508_v41 = vsel %vm506_vm2, %v507_v36, 0.0  ;;  %v517_v42 = vsel %vm515_vm3, %v516_v37, 0.0 }
 0x196   : > { %v513_v44 = vmul.f32 %v512_v39, %v508_v41  ;;  %v522_v45 = vmul.f32 %v521_v40, %v517_v42 }
 0x198   : > { %1884 = vmatpush3.bf16.msra.mxu0 %v1883_v29  ;;  %v523_v47 = vadd.f32 %v522_v45, %v513_v44 }
 0x199   : > { %1792 = vmatprep.subr.mxu0 %v2173_v14 }
 0x19a   : > { %v529_v49 = vadd.f32 %v528_v48, %v523_v47 }
 0x19c   : > { %v537_v53 = vadd.f32 %v1702_v50, %v529_v49  ;;  %v2193_v49 = vmov 2   ;;  %v2194_v50 = vmov 4  }
 0x266   : > { %v618_v52 = vpop.f32.mrb[0].mxu0 }
 0x267   : > { %v619_v54 = vadd.f32 %v1703_v51, %v618_v52  ;;  %v1780_v55 = vpop.f32.mrb[1].mxu0 }
 0x269   : > { %v622_v56 = vmul.f32 %v619_v54, %v537_v53 }
 0x26b   : > { %v623_v57 = vadd.f32 %v622_v56, %v502_v23  ;;  %v2199_v56 = vmov 6  }
 0x26d   : > { %1790 = vmatmul.mubr.msk.f32.vlgmr.msra.gmra.mrb[2].mxu0 %vm472_vm0, %v623_v57  ;;  %v2200_v57 = vmov 7  }
 0x26e   : > { %1794 = vmatprep.mubr.msk.f32.mxu0 %vm2172_vm1, %v2173_v14 }
 0x340   : > { %v2488_v58 = vpop.f32.mrb[2].mxu0 }
 0x341   : > { %756 = vperm.xlu0 %2011, %v2488_v58   ;;  %741 = vperm.xlu1 %2009, %v2488_v58   ;;  %v1791_v59 = vpop.f32.mrb[3].mxu0  ;;  %v2508_v18 = vmul.f32 0.70710677, %v2488_v58 }
 0x342   : > { %v2201_v59 = vmov 5  }
 0x345   : > { %2013 = vset.pattern.permute.xlu0 %v2176_v60  ;;  %2010 = vset.pattern.permute.xlu1 %v2177_v61 }
 0x346   : > { %1048 = vperm.xlu0 %2013, %v2488_v58   ;;  %746 = vperm.xlu1 %2010, %v2488_v58  }
 0x34a   : > { %2014 = vset.pattern.permute.xlu0 %v2178_v62  ;;  %2012 = vset.pattern.permute.xlu1 %v2179_v63 }
 0x34b   : > { %1053 = vperm.xlu0 %2014, %v2488_v58   ;;  %751 = vperm.xlu1 %2012, %v2488_v58  }
 0x34f   : > { %2015 = vset.pattern.permute.xlu0 %v2180_v1 }
 0x350   : > { %1058 = vperm.xlu0 %2015, %v2488_v58  }
 0x354   : > { %2016 = vset.pattern.permute.xlu0 %v2181_v2 }
 0x355   : > { %708 = vperm.xlu0 %2016, %v2488_v58  }
 0x359   : > { %2018 = vset.pattern.permute.xlu0 %v2182_v3 }
 0x35a   : > { %718 = vperm.xlu0 %2018, %v2488_v58  }
 0x35e   : > { %2019 = vset.pattern.permute.xlu0 %v2183_v4 }
 0x35f   : > { %1063 = vperm.xlu0 %2019, %v2488_v58  }
 0x363   : > { %2020 = vset.pattern.permute.xlu0 %v2184_v5 }
 0x3c0   : > { %v757_v6 = vpop.permute.xlu0 %756  ;;  %v742_v7 = vpop.permute.xlu1 %741 }
 0x3c1   : > { %v744_v8 = vmul.f32 %v742_v7, %v2488_v58  ;;  %v759_v15 = vmul.f32 %v757_v6, %v2488_v58 }
 0x3c3   : > { %761 = vrot.lane.b32.xlu1 %v744_v8, %s2185_s25 }
 0x3c5   : > { %v1049_v9 = vpop.permute.xlu0 %1048  ;;  %v747_v11 = vpop.permute.xlu1 %746 }
 0x3c6   : > { %v1051_v12 = vmul.f32 %v1049_v9, %v2488_v58  ;;  %v749_v13 = vmul.f32 %v747_v11, %v2488_v58 }
 0x3c8   : > { %1068 = vrot.lane.b32.xlu0 %v1051_v12, %s2186_s21  ;;  %765 = vrot.lane.b32.xlu1 %v749_v13, %s2187_s22  ;;  %s2743_s21 = sld [smem:[#allocation16_spill]] }
 0x3ca   : > { %v1054_v16 = vpop.permute.xlu0 %1053  ;;  %v752_v25 = vpop.permute.xlu1 %751 }
 0x3cb   : > { %v1056_v17 = vmul.f32 %v1054_v16, %v2488_v58  ;;  %v754_v31 = vmul.f32 %v752_v25, %v2488_v58 }
 0x3cc   : > { %769 = vrot.lane.b32.xlu1 %v759_v15, %s2188_s15 }
 0x3cd   : > { %1072 = vrot.lane.b32.xlu0 %v1056_v17, %s2185_s25  ;;  %s2202_s25 = smov 125  }
 0x3cf   : > { %v1059_v19 = vpop.permute.xlu0 %1058 }
 0x3d0   : > { %v1061_v20 = vmul.f32 %v1059_v19, %v2488_v58  ;;  %790 = vrot.lane.b32.xlu1 %v2508_v18, %s2189_s30  ;;  %s2741_s30 = sld [smem:[#allocation14_spill]] }
 0x3d2   : > { %1076 = vrot.lane.b32.xlu0 %v1061_v20, %s2187_s22 }
 0x3d4   : > { %v709_v21 = vpop.permute.xlu0 %708 }
 0x3d5   : > { %v711_v22 = vmul.f32 %v709_v21, %v2488_v58 }
 0x3d6   : > { %703 = vperm.xlu0 %2020, %v2488_v58  }
 0x3d9   : > { %v719_v23 = vpop.permute.xlu0 %718 }
 0x3da   : > { %v721_v24 = vmul.f32 %v719_v23, %v2488_v58 }
 0x3dc   : > { %731 = vrot.lane.b32.xlu0 %v721_v24, %s2190_s18 }
 0x3de   : > { %v1064_v27 = vpop.permute.xlu0 %1063 }
 0x3df   : > { %v1066_v37 = vmul.f32 %v1064_v27, %v2488_v58 }
 0x435   : > { %v762_v26 = vpop.permute.xlu1 %761 }
 0x43a   : > { %v1069_v28 = vpop.permute.xlu0 %1068  ;;  %v766_v29 = vpop.permute.xlu1 %765 }
 0x43b   : > { %v772_v30 = vsel %vm734_vm4, %v762_v26, %v766_v29 }
 0x43c   : > { %v773_v32 = vsel %vm736_vm5, %v772_v30, %v754_v31 }
 0x43e   : > { %v770_v33 = vpop.permute.xlu1 %769 }
 0x43f   : > { %v774_v34 = vsel %vm738_vm6, %v773_v32, %v770_v33  ;;  %v1073_v35 = vpop.permute.xlu0 %1072 }
 0x440   : > { %v789_v36 = vmul.f32 0.35355338, %v774_v34  ;;  %v1079_v38 = vsel %vm734_vm4, %v1069_v28, %v1073_v35 }
 0x442   : > { %794 = vrot.lane.b32.xlu1 %v789_v36, %s2191_s10  ;;  %v791_v43 = vpop.permute.xlu1 %790 }
 0x443   : > { %v797_v44 = vsel %vm785_vm7, 1.0, %v791_v43 }
 0x444   : > { %v1077_v39 = vpop.permute.xlu0 %1076 }
 0x445   : > { %v1080_v40 = vsel %vm736_vm5, %v1079_v38, %v1077_v39 }
 0x446   : > { %v1081_v41 = vsel %vm738_vm6, %v1080_v40, %v1066_v37  ;;  %799 = vrot.lane.b32.xlu1 %v2488_v58, %s2192_s12  ;;  %s2742_s12 = sld [smem:[#allocation15_spill]] }
 0x447   : > { %v1092_v42 = vmul.f32 0.35355338, %v1081_v41 }
 0x449   : > { %1097 = vrot.lane.b32.xlu0 %v1092_v42, %s2191_s10 }
 0x455   : > { %v704_v60 = vpop.permute.xlu0 %703 }
 0x456   : > { %v706_v62 = vmul.f32 %v704_v60, %v2488_v58 }
 0x459   : > { %v732_v2 = vpop.permute.xlu0 %731 }
 0x4b4   : > { %v795_v45 = vpop.permute.xlu1 %794 }
 0x4b5   : > { %v798_v46 = vsel %vm787_vm8, %v797_v44, %v795_v45 }
 0x4b6   : > { %804 = vxpose.xlu1.b32.start.end [1/1] (short) (narrow) %v798_v46, 24 }
 0x4b8   : > { %v800_v47 = vpop.permute.xlu1 %799 }
 0x4b9   : > { %v803_v48 = vsel %vm802_vm9, %v800_v47, 1.0 }
 0x4ba   : > { %1793 = vmatpush3.msra.mxu0 %v803_v48 }
 0x4bb   : > { %1888 = vmatprep.subr.bf16.mxu0 %v2171_v10  ;;  %v1098_v13 = vpop.permute.xlu0 %1097 }
 0x4d4   : > { %2017 = vset.pattern.permute.xlu1 %v2193_v49 }
 0x4dc   : > { %713 = vperm.xlu1 %2017, %v2488_v58  }
 0x4e0   : > { %723 = vrot.lane.b32.xlu1 %v711_v22, %s2188_s15 }
 0x4e1   : > { %2021 = vset.pattern.permute.xlu1 %v2194_v50 }
 0x536   : > { %v820_v51 = vpop.trf.xlu1 }
 0x537   : > { %1795 = vmatmul.mubr.msk.f32.vlgmr.msra.gmra.mrb[4].mxu0 %vm736_vm5, %v820_v51 }
 0x538   : > { %1797 = vmatprep.mubr.msk.f32.mxu0 %vm2172_vm1, %v2173_v14 }
 0x53a   : > { %v821_v52 = vpop.trf.xlu1 }
 0x53b   : > { %1798 = vmatmul.mubr.msk.f32.gmra.mrb[6].mxu0 %vm736_vm5, %v821_v52 }
 0x53c   : > { %1800 = vmatprep.mubr.msk.f32.mxu0 %vm2172_vm1, %v2173_v14 }
 0x53e   : > { %v822_v53 = vpop.trf.xlu1 }
 0x53f   : > { %1801 = vmatmul.mubr.msk.f32.gmra.mrb[8].mxu0 %vm736_vm5, %v822_v53 }
 0x540   : > { %1829 = vmatprep.mubr.msk.f32.mxu0 %vm2172_vm1, %v2173_v14 }
 0x55b   : > { %v714_v54 = vpop.permute.xlu1 %713 }
 0x55c   : > { %v716_v55 = vmul.f32 %v714_v54, %v2488_v58 }
 0x55e   : > { %727 = vrot.lane.b32.xlu1 %v716_v55, %s2195_s17  ;;  %v2203_v55 = vmov 16  }
 0x55f   : > { %v724_v61 = vpop.permute.xlu1 %723 }
 0x560   : > { %v735_v63 = vsel %vm734_vm4, %v706_v62, %v724_v61 }
 0x562   : > { %1093 = vrot.lane.b32.xlu1 %v2508_v18, %s2196_s19  ;;  %s2204_s19 = smov 16  }
 0x566   : > { %778 = vrot.lane.b32.xlu1 %v2508_v18, %s2197_s14 }
 0x56a   : > { %1102 = vrot.lane.b32.xlu1 %v2488_v58, %s2198_s16 }
 0x56e   : > { %1013 = vperm.xlu1 %2021, %v2488_v58  }
 0x572   : > { %2022 = vset.pattern.permute.xlu1 %v2199_v56 }
 0x573   : > { %1023 = vperm.xlu1 %2022, %v2488_v58  }
 0x577   : > { %2023 = vset.pattern.permute.xlu1 %v2200_v57 }
 0x578   : > { %1028 = vperm.xlu1 %2023, %v2488_v58  }
 0x57c   : > { %2024 = vset.pattern.permute.xlu1 %v2201_v59 }
 0x57d   : > { %1018 = vperm.xlu1 %2024, %v2488_v58  }
 0x581   : > { %2025 = vset.pattern.permute.xlu1 %v2203_v55 }
 0x5d0   : > { %v728_v1 = vpop.permute.xlu1 %727 }
 0x5d1   : > { %v737_v3 = vsel %vm736_vm5, %v735_v63, %v728_v1  ;;  %v1317_v63 = vld [vmem:[%s2710_s8] sm:$0xff]  ;;  %v1318_v1 = vld [vmem:[%s2710_s8 + $0x8] sm:$0xff] }
 0x5d2   : > { %v739_v4 = vsel %vm738_vm6, %v737_v3, %v732_v2  ;;  %v1319_v2 = vld [vmem:[%s2710_s8 + $0x10] sm:$0xff]  ;;  %v1892_v3 = vpack.c.bf16 %v1318_v1, %v1317_v63 }
 0x5d3   : > { %v776_v5 = vmul.f32 0.35355338, %v739_v4  ;;  %v1320_v4 = vld [vmem:[%s2710_s8 + $0x18] sm:$0xff] }
 0x5d4   : > { %v1094_v6 = vpop.permute.xlu1 %1093 }
 0x5d5   : > { %782 = vrot.lane.b32.xlu0 %v776_v5, %s2191_s10  ;;  %v1100_v12 = vsel %vm785_vm7, 1.0, %v1094_v6  ;;  %v1895_v5 = vpack.c.bf16 %v1320_v4, %v1319_v2  ;;  %v1394_v6 = vld [vmem:[#allocation5] sm:$0xff] }
 0x5d6   : > { %v1101_v16 = vsel %vm787_vm8, %v1100_v12, %v1098_v13 }
 0x5d8   : > { %v779_v7 = vpop.permute.xlu1 %778 }
 0x5d9   : > { %v786_v28 = vsel %vm785_vm7, 1.0, %v779_v7  ;;  %v1395_v7 = vld [vmem:[#allocation5 + $0x8] sm:$0xff] }
 0x5dc   : > { %v1103_v8 = vpop.permute.xlu1 %1102 }
 0x5dd   : > { %v1105_v31 = vsel %vm802_vm9, %v1103_v8, 1.0  ;;  %v1396_v8 = vld [vmem:[#allocation5 + $0x10] sm:$0xff] }
 0x5ed   : > { %v1014_v9 = vpop.permute.xlu1 %1013 }
 0x5ee   : > { %v1016_v11 = vmul.f32 %v1014_v9, %v2488_v58  ;;  %v1898_v9 = vpack.c.bf16 %v1395_v7, %v1394_v6 }
 0x5f0   : > { %1033 = vrot.lane.b32.xlu1 %v1016_v11, %s2187_s22  ;;  %v1397_v11 = vld [vmem:[#allocation5 + $0x18] sm:$0xff] }
 0x5f1   : > { %v1901_v12 = vpack.c.bf16 %v1397_v11, %v1396_v8 }
 0x5f2   : > { %v1024_v15 = vpop.permute.xlu1 %1023 }
 0x5f3   : > { %v1026_v17 = vmul.f32 %v1024_v15, %v2488_v58  ;;  %1106 = vxpose.xlu0.b32.start.end [1/1] (short) (narrow) %v1101_v16, 24 }
 0x5f5   : > { %1037 = vrot.lane.b32.xlu1 %v1026_v17, %s2188_s15 }
 0x5f7   : > { %v1029_v19 = vpop.permute.xlu1 %1028 }
 0x5f8   : > { %v1031_v20 = vmul.f32 %v1029_v19, %v2488_v58 }
 0x5fa   : > { %1041 = vrot.lane.b32.xlu1 %v1031_v20, %s2195_s17  ;;  %s1722_s17 = sshll.u32 %s2298_s29, 7  ;;  %s1597_s29 = scalar_lea.sflag [#allocation4], %s2413_s13 }
 0x5fb   : > { %s2657_s22 = scalar_lea.hbm %s2743_s21, %s1722_s17 }
 0x5fc   : > { %v1019_v32 = vpop.permute.xlu1 %1018 }
 0x60a   : > { %v911_v21 = vpop.f32.mrb[4].mxu0 }
 0x60b   : > { %v1796_v22 = vpop.f32.mrb[5].mxu0 }
 0x60e   : > { %v916_v23 = vpop.f32.mrb[6].mxu0 }
 0x60f   : > { %v1886_v24 = vpack.c.bf16 %v916_v23, %v911_v21  ;;  %v1799_v25 = vpop.f32.mrb[7].mxu0  ;;  %v1505_v23 = vld [vmem:[%s2713_s11] sm:$0xff] }
 0x611   : > { %1887 = vmatpush3.bf16.msra.mxu1 %v1886_v24  ;;  %v1506_v24 = vld [vmem:[%s2713_s11 + $0x8] sm:$0xff] }
 0x612   : > { %v921_v26 = vpop.f32.mrb[8].mxu0  ;;  %1807 = vmatprep.subr.mxu1 %v2173_v14  ;;  %v1904_v25 = vpack.c.bf16 %v1506_v24, %v1505_v23 }
 0x613   : > { %v1802_v27 = vpop.f32.mrb[9].mxu0 }
 0x615   : > { %1808 = vmatpush3.msk.msra.mxu1 %vm929_vm10, %v921_v26  ;;  %v1508_v26 = vld [vmem:[%s2713_s11 + $0x18] sm:$0xff] }
 0x616   : > { %1812 = vmatprep.subr.mxu1 %v2173_v14 }
 0x61c   : > { %2026 = vset.pattern.permute.xlu0 %v2203_v55  ;;  %v2205_v55 = vmov -1.0  }
 0x624   : > { %1083 = vrot.lane.b32.xlu0 %v2508_v18, %s2202_s25  ;;  %v1021_v18 = vmul.f32 %v1019_v32, %v2488_v58  ;;  %v1512_v32 = vld [vmem:[%s2713_s11 + $0x38] sm:$0xff] }
 0x647   : > { %v783_v29 = vpop.permute.xlu0 %782 }
 0x648   : > { %v788_v30 = vsel %vm787_vm8, %v786_v28, %v783_v29  ;;  %v1509_v28 = vld [vmem:[%s2713_s11 + $0x20] sm:$0xff]  ;;  %v1510_v29 = vld [vmem:[%s2713_s11 + $0x28] sm:$0xff] }
 0x649   : > { %1810 = vmatmul.mubr.msk.f32.vlgmr.msra.gmra.mrb[0].mxu1 %vm925_vm11, %v788_v30  ;;  %v1910_v30 = vpack.c.bf16 %v1510_v29, %v1509_v28 }
 0x64a   : > { %1813 = vmatpush3.msra.mxu1 %v1105_v31  ;;  %1814 = vmatprep.mubr.msk.f32.mxu1 %vm2172_vm1, %v2173_v14  ;;  %v1511_v31 = vld [vmem:[%s2713_s11 + $0x30] sm:$0xff] }
 0x64b   : > { %1891 = vmatprep.subr.bf16.mxu1 %v2171_v10 }
 0x662   : > { %v1034_v33 = vpop.permute.xlu1 %1033 }
 0x663   : > { %v1044_v35 = vsel %vm734_vm4, %v1034_v33, %v1021_v18  ;;  %v1913_v33 = vpack.c.bf16 %v1512_v32, %v1511_v31 }
 0x667   : > { %v1038_v34 = vpop.permute.xlu1 %1037 }
 0x668   : > { %v1045_v36 = vsel %vm736_vm5, %v1044_v35, %v1038_v34  ;;  %v1717_v34 = vld [vmem:[%s2741_s30] ss:$0 sm:$0xff] }
 0x66c   : > { %v1042_v37 = vpop.permute.xlu1 %1041 }
 0x66d   : > { %v1046_v38 = vsel %vm738_vm6, %v1045_v36, %v1042_v37 }
 0x66e   : > { %v1082_v39 = vmul.f32 0.35355338, %v1046_v38 }
 0x670   : > { %1087 = vrot.lane.b32.xlu1 %v1082_v39, %s2191_s10 }
 0x673   : > { %v1122_v40 = vpop.trf.xlu0 }
 0x674   : > { %1815 = vmatmul.mubr.msk.f32.vlgmr.msra.gmra.mrb[2].mxu1 %vm736_vm5, %v1122_v40 }
 0x675   : > { %1817 = vmatprep.mubr.msk.f32.mxu1 %vm2172_vm1, %v2173_v14  ;;  %1893 = vmatpush3.bf16.msra.mxu1 %v1892_v3 }
 0x676   : > { %1894 = vmatprep.subr.bf16.mxu1 %v2171_v10 }
 0x677   : > { %v1123_v41 = vpop.trf.xlu0 }
 0x678   : > { %1818 = vmatmul.mubr.msk.f32.gmra.mrb[4].mxu1 %vm736_vm5, %v1123_v41 }
 0x679   : > { %1820 = vmatprep.mubr.msk.f32.mxu1 %vm2172_vm1, %v2173_v14  ;;  %1896 = vmatpush3.bf16.msra.mxu1 %v1895_v5 }
 0x67a   : > { %1903 = vmatprep.subr.bf16.mxu1 %v2171_v10 }
 0x67b   : > { %v1124_v58 = vpop.trf.xlu0 }
 0x67c   : > { %1821 = vmatmul.mubr.msk.f32.gmra.mrb[6].mxu1 %vm736_vm5, %v1124_v58 }
 0x67d   : > { %1840 = vmatprep.mubr.msk.f32.mxu1 %vm2172_vm1, %v2173_v14 }
 0x696   : > { %v1084_v49 = vpop.permute.xlu0 %1083 }
 0x697   : > { %v1090_v53 = vsel %vm785_vm7, 1.0, %v1084_v49 }
 0x6e2   : > { %v1088_v50 = vpop.permute.xlu1 %1087 }
 0x6e3   : > { %v1091_v54 = vsel %vm787_vm8, %v1090_v53, %v1088_v50 }
 0x71c   : > { %v999_v42 = vpop.f32.mrb[0].mxu1 }
 0x71d   : > { %v1811_v43 = vpop.f32.mrb[1].mxu1  ;;  %v1003_v60 = vadd.f32 1e-12, %v999_v42 }
 0x747   : > { %v1213_v44 = vpop.f32.mrb[2].mxu1 }
 0x748   : > { %v1816_v45 = vpop.f32.mrb[3].mxu1 }
 0x74b   : > { %v1218_v46 = vpop.f32.mrb[4].mxu1 }
 0x74c   : > { %v1889_v47 = vpack.c.bf16 %v1218_v46, %v1213_v44  ;;  %v1819_v48 = vpop.f32.mrb[5].mxu1 }
 0x74e   : > { %1890 = vmatpush3.bf16.msra.mxu0 %v1889_v47 }
 0x74f   : > { %v1223_v51 = vpop.f32.mrb[6].mxu1  ;;  %1827 = vmatprep.subr.mxu0 %v2173_v14 }
 0x750   : > { %v1822_v52 = vpop.f32.mrb[7].mxu1 }
 0x752   : > { %1828 = vmatpush3.msk.msra.mxu0 %vm929_vm10, %v1223_v51 }
 0x753   : > { %1830 = vmatmul.mubr.msk.f32.vlgmr.msra.gmra.mrb[10].mxu0 %vm925_vm11, %v1091_v54  ;;  %1897 = vmatprep.subr.bf16.mxu0 %v2171_v10 }
 0x754   : > { %1851 = vmatprep.mubr.msk.f32.mxu0 %vm2172_vm1, %v2173_v14  ;;  %1899 = vmatpush3.bf16.msra.mxu0 %v1898_v9 }
 0x755   : > { %1900 = vmatprep.subr.bf16.mxu0 %v2171_v10 }
 0x758   : > { %1902 = vmatpush3.bf16.msra.mxu0 %v1901_v12 }
 0x826   : > { %v1299_v56 = vpop.f32.mrb[10].mxu0 }
 0x827   : > { %v1303_v57 = vadd.f32 1e-12, %v1299_v56  ;;  %v1831_v59 = vpop.f32.mrb[11].mxu0 }
 0x829   : > { %2029 = vrcp.f32 %v1303_v57 }
 0x82a   : > { %2031 = vrcp.f32 %v1003_v60 }
 0x833   : > { %v2030_v61 = vpop.eup %2029 }
 0x834   : > { %1308 = vperm.xlu1 %2025, %v2030_v61   ;;  %v2032_v62 = vpop.eup %2031 }
 0x838   : > { %1008 = vperm.xlu1 %2025, %v2032_v62   ;;  %v1719_v62 = vld [vmem:[%s2742_s12] ss:$0 sm:$0xff] }
 0x8b3   : > { %v1309_v13 = vpop.permute.xlu1 %1308 }
 0x8b4   : > { %v1311_v15 = vmul.f32 %v1309_v13, %v1299_v56 }
 0x8b6   : > { %1313 = vrot.lane.b32.xlu1 %v1311_v15, %s2204_s19  ;;  %s470_s19 = scalar_lea.vmem [#allocation7], %s1697_s23  ;;  %s2206_s23 = smov [#allocation7]  }
 0x8b7   : > { %v1009_v16 = vpop.permute.xlu1 %1008  ;;  %s1610_s14 = sshll.u32 %s470_s19, 4  ;;  %s2099_s30 = sshll.u32 %s2206_s23, 4  ;;  %s2659_s14 = int_to_ptr.vmem [resolvable:$true] %s1610_s14  ;;  %s2100_s30 = int_to_ptr.vmem [resolvable:$false] %s2099_s30 }
 0x8b8   : > { %v1011_v17 = vmul.f32 %v1009_v16, %v999_v42  ;;  %s2095_s15 = scalar_lea.vmem %s2659_s14, 128  ;;  %s2101_s18 = scalar_lea.vmem %s2100_s30, 256 }
 0x8b9   : > { %p2096_p4 = scmp.ne.s32.totalorder %s2659_s14, %s2095_s15  ;;  %p2102_p10 = scmp.lt.s32.totalorder %s2659_s14, %s2100_s30 }
 0x8ba   : > { %p2103_p13 = scmp.lt.s32.totalorder %s2101_s18, %s2095_s15 }
 0x8bb   : > { %p2097_p6 = pnand %p2096_p4, %p2368_p12 }
 0x8bc   : > { %p2104_p3 = por %p2103_p13, %p2102_p10 }
 0x8bd   : > { %p2098_p8 = pneg %p2097_p6 }
 0x8bf   : > { %p2105_p7 = pnand %p2104_p3, %p2098_p8 }
 0x928   : > { %v1314_v19 = vpop.permute.xlu1 %1313 }
 0x929   : > { %v1316_v20 = vsel %vm802_vm9, %v1011_v17, %v1314_v19 }
 0x92a   : > { %1841 = vmatmul.mubr.msk.f32.vlgmr.msra.gmra.mrb[8].mxu1 %vm472_vm0, %v1316_v20 }
 0x92b   : > { %1870 = vmatprep.mubr.msk.f32.mxu1 %vm2172_vm1, %v2173_v14  ;;  %1905 = vmatpush3.bf16.msra.mxu1 %v1904_v25  ;;  %v1507_v14 = vld [vmem:[%s2713_s11 + $0x10] sm:$0xff] }
 0x92c   : > { %1906 = vmatprep.subr.bf16.mxu1 %v2171_v10  ;;  %v1907_v27 = vpack.c.bf16 %v1508_v26, %v1507_v14 }
 0x92f   : > { %1908 = vmatpush3.bf16.msra.mxu1 %v1907_v27 }
 0x930   : > { %1909 = vmatprep.subr.bf16.mxu1 %v2171_v10 }
 0x933   : > { %1911 = vmatpush3.bf16.msra.mxu1 %v1910_v30 }
 0x934   : > { %1912 = vmatprep.subr.bf16.mxu1 %v2171_v10 }
 0x937   : > { %1914 = vmatpush3.bf16.msra.mxu1 %v1913_v33 }
 0x9fd   : > { %v1390_v21 = vpop.f32.mrb[8].mxu1 }
 0x9fe   : > { %v1842_v22 = vpop.f32.mrb[9].mxu1  ;;  %1852 = vmatmul.mubr.msk.f32.vlgmr.msra.gmra.mrb[12].mxu0 %vm472_vm0, %v1390_v21 }
 0xad1   : > { %v1474_v18 = vpop.f32.mrb[12].mxu0 }
 0xad2   : > { %v1475_v35 = vadd.f32 %v1717_v34, %v1474_v18  ;;  %v1853_v36 = vpop.f32.mrb[13].mxu0 }
 0xad4   : > { %v1479_v37 = vmul.f32 0.70710677, %v1475_v35  ;;  %v1478_v59 = vmul.f32 0.5, %v1475_v35 }
 0xad6   : > { %v1482_v38 = vand.u32 2147483647, %v1479_v37  ;;  %vm1480_vm12 = vcmp.ge.f32.partialorder %v1479_v37, 0.0 }
 0xad7   : > { %v1481_v56 = vsel %vm1480_vm12, 1.0, %v2205_v55 }
 0xad8   : > { %v1483_v10 = vmul.f32 0.3275911, %v1482_v38  ;;  %v1496_v40 = vsub.f32 0.0, %v1482_v38 }
 0xada   : > { %v1484_v39 = vadd.f32 1.0, %v1483_v10  ;;  %v1497_v58 = vmul.f32 %v1496_v40, %v1482_v38 }
 0xadc   : > { %2033 = vrcp.f32 %v1484_v39  ;;  %v1498_v44 = vmul.f32 1.442695, %v1497_v58 }
 0xade   : > { %2035 = vpow2.f32 %v1498_v44 }
 0xae6   : > { %v2034_v41 = vpop.eup %2033 }
 0xae7   : > { %v1487_v42 = vmul.f32 1.0614054, %v2034_v41 }
 0xae8   : > { %v2036_v52 = vpop.eup %2035 }
 0xae9   : > { %v1488_v43 = vadd.f32 -1.4531521, %v1487_v42 }
 0xaeb   : > { %v1489_v45 = vmul.f32 %v2034_v41, %v1488_v43 }
 0xaed   : > { %v1490_v46 = vadd.f32 1.4214138, %v1489_v45 }
 0xaef   : > { %v1491_v47 = vmul.f32 %v2034_v41, %v1490_v46 }
 0xaf1   : > { %v1492_v48 = vadd.f32 -0.28449672, %v1491_v47 }
 0xaf3   : > { %v1493_v49 = vmul.f32 %v2034_v41, %v1492_v48 }
 0xaf5   : > { %v1494_v50 = vadd.f32 0.2548296, %v1493_v49 }
 0xaf7   : > { %v1495_v51 = vmul.f32 %v2034_v41, %v1494_v50 }
 0xaf9   : > { %v1500_v53 = vmul.f32 %v2036_v52, %v1495_v51 }
 0xafb   : > { %v1501_v54 = vsub.f32 1.0, %v1500_v53 }
 0xafd   : > { %v1502_v57 = vmul.f32 %v1501_v54, %v1481_v56 }
 0xaff   : > { %v1503_v60 = vadd.f32 1.0, %v1502_v57 }
 0xb01   : > { %v1504_v61 = vmul.f32 %v1503_v60, %v1478_v59 }
 0xb03   : > { %1871 = vmatmul.mubr.msk.f32.vlgmr.msra.gmra.mrb[10].mxu1 %vm1520_vm13, %v1504_v61 }
 0xbd6   : > { %v1590_v63 = vpop.f32.mrb[10].mxu1 }
 0xbd7   : > { %v1591_v1 = vadd.f32 %v1719_v62, %v1590_v63  ;;  %v1872_v2 = vpop.f32.mrb[11].mxu1 }
 0xbd9   : > { %v1594_v3 = vadd.f32 %v1591_v1, %v2427_v0 }
 0xbdb   : > { %1595 = vst.msk [vmem:[%s470_s19] sm:$0xff] %vm472_vm0, %v1594_v3 }
 0xbdc   : > { %2108 = shalt.err (!%p2105_p7)
}
 0xbdd   : > { %s2109_s13 = scalar_lea.hbm %s2657_s22, 128  ;;  %s2113_s17 = scalar_lea.hbm %s2743_s21, 256 }
 0xbde   : > { %p2110_p9 = scmp.ne.s32.totalorder %s2657_s22, %s2109_s13  ;;  %p2114_p0 = scmp.lt.u32.totalorder %s2657_s22, %s2743_s21 }
 0xbdf   : > { %p2115_p11 = scmp.lt.u32.totalorder %s2113_s17, %s2109_s13  ;;  %p2117_p4 = scmp.lt.u32.totalorder %s2109_s13, %s2657_s22 }
 0xbe0   : > { %p2111_p2 = pnand %p2110_p9, %p2368_p12 }
 0xbe1   : > { %p2116_p1 = por %p2115_p11, %p2114_p0 }
 0xbe2   : > { %p2112_p5 = pneg %p2111_p2 }
 0xbe3   : > { %p2118_p6 = por %p2117_p4, %p2116_p1 }
 0xbe5   : > { %p2119_p8 = pnand %p2118_p6, %p2112_p5 }
 0xbe7   : > { %2122 = shalt.err (!%p2119_p8)
}
 0xbe8   : > { %1921 = dma.vmem_to_hbm [thread:$0]  (%p2368_p12), %s2659_s14, 128, %s2657_s22, %s1597_s29  }
 0xbe9 PF: > { %s2744_s25 = sld [smem:[#allocation11_spill]]  ;;  %s2745_s15 = sld [smem:[#allocation12_spill]] }
 0xbea   : > { %p2747_p13 = scmp.ge.s32.totalorder %s2165_s28, 2 }
 0xbef   : > { %s1622_s23 = sand.u32 1, %s2744_s25   ;;  %p2746_p10 = scmp.ne.s32.totalorder %s2745_s15, 0 }
 0xbf0   : > { %s1623_s30 = scalar_lea.sflag [#allocation4], %s1622_s23 }
 0xbf1   : > { %p1932_p3 = pnand %p2747_p13, %p2746_p10 }
 0xbf3   : > { %2148 = dma.done.wait (!%p1932_p3), %s1623_s30, 128  }
 0xbf4   : > { %2150 = vsyncadd (!%p1932_p3), %s1623_s30, 4294967168  ;;  %s2748_s28 = sld [smem:[#allocation13_spill]]  ;;  %s2749_s25 = smov %s2157_s26 }
 0xbf5   : > { %s2750_s26 = smov %s2161_s27  ;;  %s2751_s27 = smov %s2364_s20 }
 0xbfa   : > { %p27_p7 = scmp.ge.s32.totalorder %s2748_s28, 4  }
 0xbfc   :  { %29 = sbr.rel (!%p27_p7) target bundleno = 10 (0xa), region = 121 }
 0xc03   :  { %1628 = vsyncpa [#allocation3], 1 }
 0xc04   :  { %1630 = vsyncpa [#allocation3 + $0x1], 1 }
 0xc05   :  { %1631 = vsyncpa [#allocation6], 1 }
 0xc06   :  { %1632 = vsyncpa [#allocation4], 1 }
 0xc07   :  { %1634 = vsyncpa [#allocation4 + $0x1], 1 }

</bundles_post_ra>
